<compile_context>
chip_gen: v6e
topology: v6e:2x2x1
jax: 0.10.0
libtpu: 0.0.40
codegen_flags: <defaults>
</compile_context>

<pallas_src>
import math
from functools import partial

import jax
import jax.numpy as jnp
from jax.experimental import pallas as pl
from jax.experimental.pallas import tpu as pltpu


_EXACT_GELU = False  # True => erf GELU (torch.nn.GELU default), slower on VALU.


# ----------------------------- in-kernel helpers -----------------------------

def _gelu(x):
    if _EXACT_GELU:
        return 0.5 * x * (1.0 + jax.lax.erf(x * (1.0 / math.sqrt(2.0))))
    c = math.sqrt(2.0 / math.pi)
    return 0.5 * x * (1.0 + jnp.tanh(c * (x + 0.044715 * x * x * x)))


def _layernorm(x, g, b, eps=1e-5):
    mu = jnp.mean(x, axis=-1, keepdims=True)
    xc = x - mu
    var = jnp.mean(xc * xc, axis=-1, keepdims=True)
    return xc * jax.lax.rsqrt(var + eps) * g + b


def _round_up(x, m):
    return (x + m - 1) // m * m


# ------------------------------ fused DiT kernel ------------------------------

def _dit_kernel(xp_ref, pos_ref, tf_ref,
                pw_ref, pb_ref, tw1_ref, tb1_ref, tw2_ref, tb2_ref,
                ln1g_ref, ln1b_ref, wqkv_ref, wproj_ref, bproj_ref,
                ln2g_ref, ln2b_ref, mw1_ref, mb1_ref, mw2_ref, mb2_ref,
                ng_ref, nb_ref, ow_ref, ob_ref,
                o_ref, h_ref, *, num_heads, batch):
    layer = pl.program_id(0)
    last_layer = pl.num_programs(0) - 1

    # ---- layer 0: patch embed + pos embed + sinusoidal-time MLP add ----
    @pl.when(layer == 0)
    def _embed():
        h = jnp.dot(xp_ref[...], pw_ref[...],
                    preferred_element_type=jnp.float32) + pb_ref[...]
        te = jnp.dot(tf_ref[...], tw1_ref[...],
                     preferred_element_type=jnp.float32) + tb1_ref[...]
        te = _gelu(te).astype(jnp.bfloat16)
        te = jnp.dot(te, tw2_ref[...],
                     preferred_element_type=jnp.float32) + tb2_ref[...]
        h_ref[...] = h + pos_ref[...] + te

    x = h_ref[...]                               # (R, C) f32, R = B*N, VMEM-resident
    R, C = x.shape
    hd = C // num_heads
    n = R // batch                               # tokens per sample
    scale = hd ** (-0.5)

    # ---- attention branch ----
    xn = _layernorm(x, ln1g_ref[...], ln1b_ref[...]).astype(jnp.bfloat16)
    qkv = jnp.dot(xn, wqkv_ref[...], preferred_element_type=jnp.float32)   # (R, 3C)

    heads = []
    for hh in range(num_heads):
        lo = hh * hd
        q = (qkv[:, lo:lo + hd] * scale).reshape(batch, n, hd).astype(jnp.bfloat16)
        k = qkv[:, C + lo:C + lo + hd].reshape(batch, n, hd).astype(jnp.bfloat16)
        v = qkv[:, 2 * C + lo:2 * C + lo + hd].reshape(batch, n, hd).astype(jnp.bfloat16)
        s = jnp.einsum('bqd,bkd->bqk', q, k,
                       preferred_element_type=jnp.float32)                 # (B, n, n)
        s = s - jnp.max(s, axis=-1, keepdims=True)
        p = jnp.exp(s)
        p = p * pl.reciprocal(jnp.sum(p, axis=-1, keepdims=True), approx=True)
        ho = jnp.einsum('bqk,bkd->bqd', p.astype(jnp.bfloat16), v,
                        preferred_element_type=jnp.float32)                # (B, n, hd)
        heads.append(ho.reshape(R, hd))
    # heads are lane-contiguous in the reference layout -> single slab, one proj.
    attn = jnp.concatenate(heads, axis=-1).astype(jnp.bfloat16)            # (R, C)
    x = x + jnp.dot(attn, wproj_ref[...],
                    preferred_element_type=jnp.float32) + bproj_ref[...]

    # ---- MLP branch ----
    xn2 = _layernorm(x, ln2g_ref[...], ln2b_ref[...]).astype(jnp.bfloat16)
    hmid = jnp.dot(xn2, mw1_ref[...],
                   preferred_element_type=jnp.float32) + mb1_ref[...]
    hmid = _gelu(hmid).astype(jnp.bfloat16)
    x = x + jnp.dot(hmid, mw2_ref[...],
                    preferred_element_type=jnp.float32) + mb2_ref[...]
    h_ref[...] = x

    # ---- last layer: final LayerNorm + (lane-padded) output projection ----
    @pl.when(layer == last_layer)
    def _final():
        xn3 = _layernorm(x, ng_ref[...], nb_ref[...]).astype(jnp.bfloat16)
        o_ref[...] = (jnp.dot(xn3, ow_ref[...],
                              preferred_element_type=jnp.float32)
                      + ob_ref[...]).astype(o_ref.dtype)


# ------------------------------ pallas wrapper --------------------------------

def fused_dit_pallas(xp_rows, pos_rows, tfeat_rows, kp, *, num_heads, batch):
    R, _ = xp_rows.shape
    hidden = kp["patch_w"].shape[1]
    out_dim_p = kp["out_w"].shape[1]
    depth = kp["blk_wqkv"].shape[0]

    def const_spec(a):                          # full 2-D array, same every step
        return pl.BlockSpec(a.shape, lambda l: (0, 0))

    def layer_spec(a):                          # leading depth axis indexed by l
        return pl.BlockSpec((pl.Squeezed(),) + a.shape[1:], lambda l: (l, 0, 0))

    in_specs = [
        const_spec(xp_rows),                    # xp   (R, patch_dim_p) bf16
        const_spec(pos_rows),                   # pos  (R, hidden)      f32
        const_spec(tfeat_rows),                 # tfeat(R, hidden)      bf16
        const_spec(kp["patch_w"]), const_spec(kp["patch_b"]),
        const_spec(kp["time_w1"]), const_spec(kp["time_b1"]),
        const_spec(kp["time_w2"]), const_spec(kp["time_b2"]),
        layer_spec(kp["blk_ln1_g"]), layer_spec(kp["blk_ln1_b"]),
        layer_spec(kp["blk_wqkv"]), layer_spec(kp["blk_wproj"]),
        layer_spec(kp["blk_bproj"]),
        layer_spec(kp["blk_ln2_g"]), layer_spec(kp["blk_ln2_b"]),
        layer_spec(kp["blk_mlp_w1"]), layer_spec(kp["blk_mlp_b1"]),
        layer_spec(kp["blk_mlp_w2"]), layer_spec(kp["blk_mlp_b2"]),
        const_spec(kp["norm_g"]), const_spec(kp["norm_b"]),
        const_spec(kp["out_w"]), const_spec(kp["out_b"]),
    ]

    grid_spec = pltpu.PrefetchScalarGridSpec(
        num_scalar_prefetch=0,
        grid=(depth,),
        in_specs=in_specs,
        out_specs=pl.BlockSpec((R, out_dim_p), lambda l: (0, 0)),
        scratch_shapes=[pltpu.VMEM((R, hidden), jnp.float32)],  # resident activation
    )

    return pl.pallas_call(
        partial(_dit_kernel, num_heads=num_heads, batch=batch),
        out_shape=jax.ShapeDtypeStruct((R, out_dim_p), jnp.float32),
        grid_spec=grid_spec,
        compiler_params=pltpu.CompilerParams(
            dimension_semantics=("arbitrary",),
            # explicit scoped-VMEM budget; re-derive against 64 MiB on v7x.
            vmem_limit_bytes=64 * 1024 * 1024),
    )(xp_rows, pos_rows, tfeat_rows,
      kp["patch_w"], kp["patch_b"],
      kp["time_w1"], kp["time_b1"], kp["time_w2"], kp["time_b2"],
      kp["blk_ln1_g"], kp["blk_ln1_b"],
      kp["blk_wqkv"], kp["blk_wproj"], kp["blk_bproj"],
      kp["blk_ln2_g"], kp["blk_ln2_b"],
      kp["blk_mlp_w1"], kp["blk_mlp_b1"], kp["blk_mlp_w2"], kp["blk_mlp_b2"],
      kp["norm_g"], kp["norm_b"], kp["out_w"], kp["out_b"])


# ------------------------------ parameter setup --------------------------------

def _xavier_uniform(key, fan_in, fan_out):
    bound = math.sqrt(6.0 / (fan_in + fan_out))
    return jax.random.uniform(key, (fan_in, fan_out), jnp.float32, -bound, bound)


def init_params(key, *, patch_dim, hidden, mlp_hidden, depth, max_patches, out_dim):
    keys = iter(jax.random.split(key, 8 + 4 * depth))
    params = {
        "patch_w": _xavier_uniform(next(keys), patch_dim, hidden),
        "patch_b": jnp.zeros((1, hidden), jnp.float32),
        "pos_embed": 0.02 * jax.random.normal(next(keys),
                                              (1, max_patches, hidden), jnp.float32),
        "time_w1": _xavier_uniform(next(keys), hidden, hidden * 2),
        "time_b1": jnp.zeros((1, hidden * 2), jnp.float32),
        "time_w2": _xavier_uniform(next(keys), hidden * 2, hidden),
        "time_b2": jnp.zeros((1, hidden), jnp.float32),
        "norm_g": jnp.ones((1, hidden), jnp.float32),
        "norm_b": jnp.zeros((1, hidden), jnp.float32),
        "out_w": _xavier_uniform(next(keys), hidden, out_dim),
        "out_b": jnp.zeros((1, out_dim), jnp.float32),
    }
    wqkv, wproj, mw1, mw2 = [], [], [], []
    for _ in range(depth):
        wqkv.append(_xavier_uniform(next(keys), hidden, hidden * 3))
        wproj.append(_xavier_uniform(next(keys), hidden, hidden))
        mw1.append(_xavier_uniform(next(keys), hidden, mlp_hidden))
        mw2.append(_xavier_uniform(next(keys), mlp_hidden, hidden))
    params.update({
        "blk_ln1_g": jnp.ones((depth, 1, hidden), jnp.float32),
        "blk_ln1_b": jnp.zeros((depth, 1, hidden), jnp.float32),
        "blk_wqkv": jnp.stack(wqkv),
        "blk_wproj": jnp.stack(wproj),
        "blk_bproj": jnp.zeros((depth, 1, hidden), jnp.float32),
        "blk_ln2_g": jnp.ones((depth, 1, hidden), jnp.float32),
        "blk_ln2_b": jnp.zeros((depth, 1, hidden), jnp.float32),
        "blk_mlp_w1": jnp.stack(mw1),
        "blk_mlp_b1": jnp.zeros((depth, 1, mlp_hidden), jnp.float32),
        "blk_mlp_w2": jnp.stack(mw2),
        "blk_mlp_b2": jnp.zeros((depth, 1, hidden), jnp.float32),
    })
    return params


# ------------------------------- model forward ---------------------------------

def simple_video_dit_forward(params, x, t, *, patch_size, num_heads):
    B, T, C, H, W = x.shape
    p = patch_size
    hidden = params["patch_w"].shape[1]
    out_dim = params["out_w"].shape[1]

    # ---- patchify (glue: pure reshape/transpose) ----
    xp = x.reshape(B, T, C, H // p, p, W // p, p)
    xp = xp.transpose(0, 1, 3, 5, 2, 4, 6)
    xp = xp.reshape(B, T * (H // p) * (W // p), C * p * p)
    N = xp.shape[1]
    patch_dim = xp.shape[-1]

    # ---- positional embedding slice (N <= max_patches branch) ----
    pos = params["pos_embed"][0, :N]                                   # (N, hidden)

    # ---- sinusoidal time features (glue; the time MLP runs in-kernel) ----
    half = hidden // 2
    freq = jnp.exp(jnp.arange(half, dtype=jnp.float32)
                   * (-math.log(10000.0) / (half - 1)))
    te = t.astype(jnp.float32)[:, None] * freq[None, :]
    tfeat = jnp.concatenate([jnp.sin(te), jnp.cos(te)], axis=-1)       # (B, hidden)

    # ---- fold batch into rows; lane-pad patch_dim / out_dim; bf16 operands ----
    pdp = _round_up(patch_dim, 128)
    odp = _round_up(out_dim, 128)
    R = B * N
    xp_rows = jnp.pad(xp.reshape(R, patch_dim),
                      ((0, 0), (0, pdp - patch_dim))).astype(jnp.bfloat16)
    pos_rows = jnp.tile(pos, (B, 1))                                   # (R, hidden) f32
    tfeat_rows = jnp.repeat(tfeat, N, axis=0).astype(jnp.bfloat16)     # (R, hidden)

    kp = dict(params)
    kp["patch_w"] = jnp.pad(params["patch_w"],
                            ((0, pdp - patch_dim), (0, 0))).astype(jnp.bfloat16)
    kp["out_w"] = jnp.pad(params["out_w"],
                          ((0, 0), (0, odp - out_dim))).astype(jnp.bfloat16)
    kp["out_b"] = jnp.pad(params["out_b"], ((0, 0), (0, odp - out_dim)))
    for name in ("time_w1", "time_w2", "blk_wqkv", "blk_wproj",
                 "blk_mlp_w1", "blk_mlp_w2"):
        kp[name] = params[name].astype(jnp.bfloat16)

    out = fused_dit_pallas(xp_rows, pos_rows, tfeat_rows, kp,
                           num_heads=num_heads, batch=B)
    out = out[:, :out_dim].reshape(B, N, out_dim)

    # ---- unpatchify (glue) ----
    c = out_dim // (p * p)
    hN, wN = H // p, W // p
    out = out.reshape(B, T, hN, wN, c, p, p)
    out = out.transpose(0, 1, 4, 2, 5, 3, 6)
    out = out.reshape(B, T, c, H, W)
    return out


# ----------------------- pure-JAX reference (f32 / erf GELU) -------------------

def _reference_forward(params, x, t, *, patch_size, num_heads):
    B, T, C, H, W = x.shape
    p = patch_size
    hidden = params["patch_w"].shape[1]
    xp = x.reshape(B, T, C, H // p, p, W // p, p).transpose(0, 1, 3, 5, 2, 4, 6)
    xp = xp.reshape(B, T * (H // p) * (W // p), C * p * p)
    N = xp.shape[1]

    def gelu_exact(v):
        return 0.5 * v * (1.0 + jax.lax.erf(v / math.sqrt(2.0)))

    def ln(v, g, b, eps=1e-5):
        mu = v.mean(-1, keepdims=True)
        xc = v - mu
        var = (xc * xc).mean(-1, keepdims=True)
        return xc * jax.lax.rsqrt(var + eps) * g + b

    h = xp @ params["patch_w"] + params["patch_b"]
    h = h + params["pos_embed"][:, :N]
    half = hidden // 2
    freq = jnp.exp(jnp.arange(half, dtype=jnp.float32)
                   * (-math.log(10000.0) / (half - 1)))
    te = t.astype(jnp.float32)[:, None] * freq[None, :]
    tf = jnp.concatenate([jnp.sin(te), jnp.cos(te)], axis=-1)
    temb = gelu_exact(tf @ params["time_w1"] + params["time_b1"]) \
        @ params["time_w2"] + params["time_b2"]
    h = h + temb[:, None, :]

    depth = params["blk_wqkv"].shape[0]
    nh, hd = num_heads, hidden // num_heads
    for l in range(depth):
        xn = ln(h, params["blk_ln1_g"][l], params["blk_ln1_b"][l])
        qkv = xn @ params["blk_wqkv"][l]
        q, k, v = (qkv[..., :hidden], qkv[..., hidden:2 * hidden],
                   qkv[..., 2 * hidden:])
        q = q.reshape(B, N, nh, hd).transpose(0, 2, 1, 3)
        k = k.reshape(B, N, nh, hd).transpose(0, 2, 1, 3)
        v = v.reshape(B, N, nh, hd).transpose(0, 2, 1, 3)
        s = (q @ k.transpose(0, 1, 3, 2)) * (hd ** -0.5)
        pmat = jax.nn.softmax(s, axis=-1)
        o = (pmat @ v).transpose(0, 2, 1, 3).reshape(B, N, hidden)
        h = h + o @ params["blk_wproj"][l] + params["blk_bproj"][l]
        xn2 = ln(h, params["blk_ln2_g"][l], params["blk_ln2_b"][l])
        h = h + gelu_exact(xn2 @ params["blk_mlp_w1"][l] + params["blk_mlp_b1"][l]) \
            @ params["blk_mlp_w2"][l] + params["blk_mlp_b2"][l]
    h = ln(h, params["norm_g"], params["norm_b"])
    out = h @ params["out_w"] + params["out_b"]
    out_dim = out.shape[-1]
    c = out_dim // (p * p)
    hN, wN = H // p, W // p
    out = out.reshape(B, T, hN, wN, c, p, p).transpose(0, 1, 4, 2, 5, 3, 6)
    return out.reshape(B, T, c, H, W)


# ------------------------------------ main --------------------------------------

if __name__ == "__main__":
    # Config consistent with SimpleVideoDiT: video_size=(2,16,16), patch_size=8,
    # in_channels=3, hidden_size=128, depth=2, num_heads=4, mlp_ratio=2.0,
    # learn_sigma=False.
    B = 2
    T, H, W = 2, 16, 16
    patch_size = 8
    in_channels = 3
    hidden = 128
    depth = 2
    num_heads = 4
    mlp_ratio = 2.0

    num_patches = T * H * W // (patch_size ** 2)
    patch_dim = in_channels * patch_size ** 2
    out_dim = in_channels * patch_size ** 2              # learn_sigma=False

    key = jax.random.PRNGKey(0)
    k_param, k_x, k_t = jax.random.split(key, 3)

    params = init_params(
        k_param,
        patch_dim=patch_dim,
        hidden=hidden,
        mlp_hidden=int(hidden * mlp_ratio),
        depth=depth,
        max_patches=num_patches * 2,
        out_dim=out_dim,
    )

    x = jax.random.normal(k_x, (B, T, in_channels, H, W), jnp.float32)
    t = jax.random.randint(k_t, (B,), 0, 1000).astype(jnp.float32)

    fwd = jax.jit(lambda pr, xx, tt: simple_video_dit_forward(
        pr, xx, tt, patch_size=patch_size, num_heads=num_heads))

    y = fwd(params, x, t)
    y = jax.block_until_ready(y)
    assert y.shape == (B, T, in_channels, H, W), y.shape
    assert bool(jnp.all(jnp.isfinite(y)))

    # Sanity check vs. f32/erf reference (loose tolerance: kernel uses bf16 MXU
    # operands and tanh-approx GELU by design).
    y_ref = _reference_forward(params, x, t, patch_size=patch_size,
                               num_heads=num_heads)
    max_diff = float(jnp.max(jnp.abs(y - y_ref)))
    assert max_diff < 0.15, f"max |diff| vs reference too large: {max_diff}"

    print("KERNEL_OK")
</pallas_src>

<mosaic_0001>
module attributes {stable_mosaic.version = 11 : i64} {
  func.func @_dit_kernel(%arg0: i32, %arg1: memref<16x256xbf16, #tpu.memory_space<vmem>>, %arg2: memref<16x128xf32, #tpu.memory_space<vmem>>, %arg3: memref<16x128xbf16, #tpu.memory_space<vmem>>, %arg4: memref<256x128xbf16, #tpu.memory_space<vmem>>, %arg5: memref<1x128xf32, #tpu.memory_space<vmem>>, %arg6: memref<128x256xbf16, #tpu.memory_space<vmem>>, %arg7: memref<1x256xf32, #tpu.memory_space<vmem>>, %arg8: memref<256x128xbf16, #tpu.memory_space<vmem>>, %arg9: memref<1x128xf32, #tpu.memory_space<vmem>>, %arg10: memref<1x1x128xf32, #tpu.memory_space<vmem>>, %arg11: memref<1x1x128xf32, #tpu.memory_space<vmem>>, %arg12: memref<1x128x384xbf16, #tpu.memory_space<vmem>>, %arg13: memref<1x128x128xbf16, #tpu.memory_space<vmem>>, %arg14: memref<1x1x128xf32, #tpu.memory_space<vmem>>, %arg15: memref<1x1x128xf32, #tpu.memory_space<vmem>>, %arg16: memref<1x1x128xf32, #tpu.memory_space<vmem>>, %arg17: memref<1x128x256xbf16, #tpu.memory_space<vmem>>, %arg18: memref<1x1x256xf32, #tpu.memory_space<vmem>>, %arg19: memref<1x256x128xbf16, #tpu.memory_space<vmem>>, %arg20: memref<1x1x128xf32, #tpu.memory_space<vmem>>, %arg21: memref<1x128xf32, #tpu.memory_space<vmem>>, %arg22: memref<1x128xf32, #tpu.memory_space<vmem>>, %arg23: memref<128x256xbf16, #tpu.memory_space<vmem>>, %arg24: memref<1x256xf32, #tpu.memory_space<vmem>>, %arg25: memref<16x256xf32, #tpu.memory_space<vmem>>, %arg26: memref<16x128xf32, #tpu.memory_space<vmem>>) attributes {dimension_semantics = [#tpu.dimension_semantics<arbitrary>], iteration_bounds = array<i64: 2>, scalar_prefetch = 0 : i64, scratch_operands = 1 : i64, tpu.core_type = #tpu.core_type<tc>, window_params = [{pipeline_mode = #tpu.pipeline_mode<synchronous>, transform_indices = @transform_0, window_bounds = array<i64: 16, 256>}, {pipeline_mode = #tpu.pipeline_mode<synchronous>, transform_indices = @transform_1, window_bounds = array<i64: 16, 128>}, {pipeline_mode = #tpu.pipeline_mode<synchronous>, transform_indices = @transform_2, window_bounds = array<i64: 16, 128>}, {pipeline_mode = #tpu.pipeline_mode<synchronous>, transform_indices = @transform_3, window_bounds = array<i64: 256, 128>}, {pipeline_mode = #tpu.pipeline_mode<synchronous>, transform_indices = @transform_4, window_bounds = array<i64: 1, 128>}, {pipeline_mode = #tpu.pipeline_mode<synchronous>, transform_indices = @transform_5, window_bounds = array<i64: 128, 256>}, {pipeline_mode = #tpu.pipeline_mode<synchronous>, transform_indices = @transform_6, window_bounds = array<i64: 1, 256>}, {pipeline_mode = #tpu.pipeline_mode<synchronous>, transform_indices = @transform_7, window_bounds = array<i64: 256, 128>}, {pipeline_mode = #tpu.pipeline_mode<synchronous>, transform_indices = @transform_8, window_bounds = array<i64: 1, 128>}, {transform_indices = @transform_9, window_bounds = array<i64: 1, 1, 128>}, {transform_indices = @transform_10, window_bounds = array<i64: 1, 1, 128>}, {transform_indices = @transform_11, window_bounds = array<i64: 1, 128, 384>}, {transform_indices = @transform_12, window_bounds = array<i64: 1, 128, 128>}, {transform_indices = @transform_13, window_bounds = array<i64: 1, 1, 128>}, {transform_indices = @transform_14, window_bounds = array<i64: 1, 1, 128>}, {transform_indices = @transform_15, window_bounds = array<i64: 1, 1, 128>}, {transform_indices = @transform_16, window_bounds = array<i64: 1, 128, 256>}, {transform_indices = @transform_17, window_bounds = array<i64: 1, 1, 256>}, {transform_indices = @transform_18, window_bounds = array<i64: 1, 256, 128>}, {transform_indices = @transform_19, window_bounds = array<i64: 1, 1, 128>}, {pipeline_mode = #tpu.pipeline_mode<synchronous>, transform_indices = @transform_20, window_bounds = array<i64: 1, 128>}, {pipeline_mode = #tpu.pipeline_mode<synchronous>, transform_indices = @transform_21, window_bounds = array<i64: 1, 128>}, {pipeline_mode = #tpu.pipeline_mode<synchronous>, transform_indices = @transform_22, window_bounds = array<i64: 128, 256>}, {pipeline_mode = #tpu.pipeline_mode<synchronous>, transform_indices = @transform_23, window_bounds = array<i64: 1, 256>}, {pipeline_mode = #tpu.pipeline_mode<synchronous>, transform_indices = @transform_24, window_bounds = array<i64: 16, 256>}]} {
    %c0_i32 = arith.constant 0 : i32
    %0 = arith.cmpi eq, %arg0, %c0_i32 : i32
    %1 = arith.extui %0 : i1 to i32
    %c0_i32_0 = arith.constant 0 : i32
    %2 = arith.cmpi ne, %1, %c0_i32_0 : i32
    scf.if %2 {
      %c0_75 = arith.constant 0 : index
      %c0_76 = arith.constant 0 : index
      %200 = vector.load %arg1[%c0_75, %c0_76] : memref<16x256xbf16, #tpu.memory_space<vmem>>, vector<16x256xbf16>
      %c0_77 = arith.constant 0 : index
      %c0_78 = arith.constant 0 : index
      %201 = vector.load %arg4[%c0_77, %c0_78] : memref<256x128xbf16, #tpu.memory_space<vmem>>, vector<256x128xbf16>
      %cst_79 = arith.constant dense<0.000000e+00> : vector<16x128xf32>
      %202 = tpu.matmul %200, %201, %cst_79 {dimension_numbers = #tpu.dot_dimension_numbers<[1], [0], [0], [1], [0, 0, 1, 1], [], []>} : vector<16x256xbf16>, vector<256x128xbf16>, vector<16x128xf32> -> vector<16x128xf32>
      %c0_80 = arith.constant 0 : index
      %c0_81 = arith.constant 0 : index
      %203 = vector.load %arg5[%c0_80, %c0_81] : memref<1x128xf32, #tpu.memory_space<vmem>>, vector<1x128xf32>
      %204 = vector.broadcast %203 : vector<1x128xf32> to vector<16x128xf32>
      %205 = arith.addf %202, %204 : vector<16x128xf32>
      %c0_82 = arith.constant 0 : index
      %c0_83 = arith.constant 0 : index
      %206 = vector.load %arg3[%c0_82, %c0_83] : memref<16x128xbf16, #tpu.memory_space<vmem>>, vector<16x128xbf16>
      %c0_84 = arith.constant 0 : index
      %c0_85 = arith.constant 0 : index
      %207 = vector.load %arg6[%c0_84, %c0_85] : memref<128x256xbf16, #tpu.memory_space<vmem>>, vector<128x256xbf16>
      %cst_86 = arith.constant dense<0.000000e+00> : vector<16x256xf32>
      %208 = tpu.matmul %206, %207, %cst_86 {dimension_numbers = #tpu.dot_dimension_numbers<[1], [0], [0], [1], [0, 0, 1, 1], [], []>} : vector<16x128xbf16>, vector<128x256xbf16>, vector<16x256xf32> -> vector<16x256xf32>
      %c0_87 = arith.constant 0 : index
      %c0_88 = arith.constant 0 : index
      %209 = vector.load %arg7[%c0_87, %c0_88] : memref<1x256xf32, #tpu.memory_space<vmem>>, vector<1x256xf32>
      %210 = vector.broadcast %209 : vector<1x256xf32> to vector<16x256xf32>
      %211 = arith.addf %208, %210 : vector<16x256xf32>
      %cst_89 = arith.constant 5.000000e-01 : f32
      %212 = vector.broadcast %cst_89 : f32 to vector<16x256xf32>
      %213 = arith.mulf %212, %211 : vector<16x256xf32>
      %cst_90 = arith.constant 4.471500e-02 : f32
      %214 = vector.broadcast %cst_90 : f32 to vector<16x256xf32>
      %215 = arith.mulf %214, %211 : vector<16x256xf32>
      %216 = arith.mulf %215, %211 : vector<16x256xf32>
      %217 = arith.mulf %216, %211 : vector<16x256xf32>
      %218 = arith.addf %211, %217 : vector<16x256xf32>
      %cst_91 = arith.constant 0.797884583 : f32
      %219 = vector.broadcast %cst_91 : f32 to vector<16x256xf32>
      %220 = arith.mulf %219, %218 : vector<16x256xf32>
      %221 = math.tanh %220 : vector<16x256xf32>
      %cst_92 = arith.constant 1.000000e+00 : f32
      %222 = vector.broadcast %cst_92 : f32 to vector<16x256xf32>
      %223 = arith.addf %222, %221 : vector<16x256xf32>
      %224 = arith.mulf %213, %223 : vector<16x256xf32>
      %225 = arith.truncf %224 : vector<16x256xf32> to vector<16x256xbf16>
      %c0_93 = arith.constant 0 : index
      %c0_94 = arith.constant 0 : index
      %226 = vector.load %arg8[%c0_93, %c0_94] : memref<256x128xbf16, #tpu.memory_space<vmem>>, vector<256x128xbf16>
      %cst_95 = arith.constant dense<0.000000e+00> : vector<16x128xf32>
      %227 = tpu.matmul %225, %226, %cst_95 {dimension_numbers = #tpu.dot_dimension_numbers<[1], [0], [0], [1], [0, 0, 1, 1], [], []>} : vector<16x256xbf16>, vector<256x128xbf16>, vector<16x128xf32> -> vector<16x128xf32>
      %c0_96 = arith.constant 0 : index
      %c0_97 = arith.constant 0 : index
      %228 = vector.load %arg9[%c0_96, %c0_97] : memref<1x128xf32, #tpu.memory_space<vmem>>, vector<1x128xf32>
      %229 = vector.broadcast %228 : vector<1x128xf32> to vector<16x128xf32>
      %230 = arith.addf %227, %229 : vector<16x128xf32>
      %c0_98 = arith.constant 0 : index
      %c0_99 = arith.constant 0 : index
      %231 = vector.load %arg2[%c0_98, %c0_99] : memref<16x128xf32, #tpu.memory_space<vmem>>, vector<16x128xf32>
      %232 = arith.addf %205, %231 : vector<16x128xf32>
      %233 = arith.addf %232, %230 : vector<16x128xf32>
      %c0_100 = arith.constant 0 : index
      %c0_101 = arith.constant 0 : index
      %234 = vector.load %arg26[%c0_100, %c0_101] : memref<16x128xf32, #tpu.memory_space<vmem>>, vector<16x128xf32>
      tpu.vector_store %arg26[%c0_100, %c0_101], %233 {strides = array<i32>} : memref<16x128xf32, #tpu.memory_space<vmem>>, vector<16x128xf32>,
    } else {
    }
    %c0 = arith.constant 0 : index
    %c0_1 = arith.constant 0 : index
    %3 = vector.load %arg26[%c0, %c0_1] : memref<16x128xf32, #tpu.memory_space<vmem>>, vector<16x128xf32>
    %c0_2 = arith.constant 0 : index
    %c0_3 = arith.constant 0 : index
    %c0_4 = arith.constant 0 : index
    %4 = vector.load %arg10[%c0_2, %c0_3, %c0_4] : memref<1x1x128xf32, #tpu.memory_space<vmem>>, vector<1x1x128xf32>
    %5 = vector.shape_cast %4 : vector<1x1x128xf32> to vector<1x128xf32>
    %c0_5 = arith.constant 0 : index
    %c0_6 = arith.constant 0 : index
    %c0_7 = arith.constant 0 : index
    %6 = vector.load %arg11[%c0_5, %c0_6, %c0_7] : memref<1x1x128xf32, #tpu.memory_space<vmem>>, vector<1x1x128xf32>
    %7 = vector.shape_cast %6 : vector<1x1x128xf32> to vector<1x128xf32>
    %cst = arith.constant dense<0.000000e+00> : vector<16xf32>
    %8 = vector.multi_reduction <add>, %3, %cst [1] : vector<16x128xf32> to vector<16xf32>
    %9 = vector.shape_cast %8 : vector<16xf32> to vector<16x1xf32>
    %cst_8 = arith.constant 1.280000e+02 : f32
    %10 = vector.broadcast %cst_8 : f32 to vector<16x1xf32>
    %11 = arith.divf %9, %10 : vector<16x1xf32>
    %12 = vector.broadcast %11 : vector<16x1xf32> to vector<16x128xf32>
    %13 = arith.subf %3, %12 : vector<16x128xf32>
    %14 = arith.mulf %13, %13 : vector<16x128xf32>
    %cst_9 = arith.constant dense<0.000000e+00> : vector<16xf32>
    %15 = vector.multi_reduction <add>, %14, %cst_9 [1] : vector<16x128xf32> to vector<16xf32>
    %16 = vector.shape_cast %15 : vector<16xf32> to vector<16x1xf32>
    %cst_10 = arith.constant 1.280000e+02 : f32
    %17 = vector.broadcast %cst_10 : f32 to vector<16x1xf32>
    %18 = arith.divf %16, %17 : vector<16x1xf32>
    %cst_11 = arith.constant 9.99999974E-6 : f32
    %19 = vector.broadcast %cst_11 : f32 to vector<16x1xf32>
    %20 = arith.addf %18, %19 : vector<16x1xf32>
    %21 = math.rsqrt %20 : vector<16x1xf32>
    %22 = vector.broadcast %21 : vector<16x1xf32> to vector<16x128xf32>
    %23 = arith.mulf %13, %22 : vector<16x128xf32>
    %24 = vector.broadcast %5 : vector<1x128xf32> to vector<16x128xf32>
    %25 = arith.mulf %23, %24 : vector<16x128xf32>
    %26 = vector.broadcast %7 : vector<1x128xf32> to vector<16x128xf32>
    %27 = arith.addf %25, %26 : vector<16x128xf32>
    %28 = arith.truncf %27 : vector<16x128xf32> to vector<16x128xbf16>
    %c0_12 = arith.constant 0 : index
    %c0_13 = arith.constant 0 : index
    %c0_14 = arith.constant 0 : index
    %29 = vector.load %arg12[%c0_12, %c0_13, %c0_14] : memref<1x128x384xbf16, #tpu.memory_space<vmem>>, vector<1x128x384xbf16>
    %30 = vector.shape_cast %29 : vector<1x128x384xbf16> to vector<128x384xbf16>
    %cst_15 = arith.constant dense<0.000000e+00> : vector<16x384xf32>
    %31 = tpu.matmul %28, %30, %cst_15 {dimension_numbers = #tpu.dot_dimension_numbers<[1], [0], [0], [1], [0, 0, 1, 1], [], []>} : vector<16x128xbf16>, vector<128x384xbf16>, vector<16x384xf32> -> vector<16x384xf32>
    %32 = vector.extract_strided_slice %31 {offsets = [0, 0], sizes = [16, 32], strides = [1, 1]} : vector<16x384xf32> to vector<16x32xf32>
    %cst_16 = arith.constant 0.176776692 : f32
    %33 = vector.broadcast %cst_16 : f32 to vector<16x32xf32>
    %34 = arith.mulf %32, %33 : vector<16x32xf32>
    %35 = vector.shape_cast %34 : vector<16x32xf32> to vector<2x8x32xf32>
    %36 = arith.truncf %35 : vector<2x8x32xf32> to vector<2x8x32xbf16>
    %37 = vector.extract_strided_slice %31 {offsets = [0, 128], sizes = [16, 32], strides = [1, 1]} : vector<16x384xf32> to vector<16x32xf32>
    %38 = vector.shape_cast %37 : vector<16x32xf32> to vector<2x8x32xf32>
    %39 = arith.truncf %38 : vector<2x8x32xf32> to vector<2x8x32xbf16>
    %40 = vector.extract_strided_slice %31 {offsets = [0, 256], sizes = [16, 32], strides = [1, 1]} : vector<16x384xf32> to vector<16x32xf32>
    %41 = vector.shape_cast %40 : vector<16x32xf32> to vector<2x8x32xf32>
    %42 = arith.truncf %41 : vector<2x8x32xf32> to vector<2x8x32xbf16>
    "tpu.trace_start"() <{level = 10 : i32, message = "bqd,bkd->bqk"}> : () -> ()
    %cst_17 = arith.constant dense<0.000000e+00> : vector<2x8x8xf32>
    %43 = tpu.matmul %36, %39, %cst_17 {dimension_numbers = #tpu.dot_dimension_numbers<[2], [2], [1], [1], [0, 0, 0, 1, 1, 1], [0], [0]>} : vector<2x8x32xbf16>, vector<2x8x32xbf16>, vector<2x8x8xf32> -> vector<2x8x8xf32>
    "tpu.trace_stop"() : () -> ()
    %cst_18 = arith.constant dense<0xFF800000> : vector<2x8xf32>
    %44 = vector.multi_reduction <maximumf>, %43, %cst_18 [2] : vector<2x8x8xf32> to vector<2x8xf32>
    %45 = vector.shape_cast %44 : vector<2x8xf32> to vector<2x8x1xf32>
    %46 = vector.broadcast %45 : vector<2x8x1xf32> to vector<2x8x8xf32>
    %47 = arith.subf %43, %46 : vector<2x8x8xf32>
    %48 = math.exp %47 : vector<2x8x8xf32>
    %cst_19 = arith.constant dense<0.000000e+00> : vector<2x8xf32>
    %49 = vector.multi_reduction <add>, %48, %cst_19 [2] : vector<2x8x8xf32> to vector<2x8xf32>
    %50 = vector.shape_cast %49 : vector<2x8xf32> to vector<2x8x1xf32>
    %51 = tpu.reciprocal %50 {approx = true} : vector<2x8x1xf32> -> vector<2x8x1xf32>
    %52 = vector.broadcast %51 : vector<2x8x1xf32> to vector<2x8x8xf32>
    %53 = arith.mulf %48, %52 : vector<2x8x8xf32>
    %54 = arith.truncf %53 : vector<2x8x8xf32> to vector<2x8x8xbf16>
    "tpu.trace_start"() <{level = 10 : i32, message = "bqk,bkd->bqd"}> : () -> ()
    %cst_20 = arith.constant dense<0.000000e+00> : vector<2x8x32xf32>
    %55 = tpu.matmul %54, %42, %cst_20 {dimension_numbers = #tpu.dot_dimension_numbers<[2], [1], [1], [2], [0, 0, 0, 1, 1, 2], [0], [0]>} : vector<2x8x8xbf16>, vector<2x8x32xbf16>, vector<2x8x32xf32> -> vector<2x8x32xf32>
    "tpu.trace_stop"() : () -> ()
    %56 = vector.shape_cast %55 : vector<2x8x32xf32> to vector<16x32xf32>
    %57 = vector.extract_strided_slice %31 {offsets = [0, 32], sizes = [16, 32], strides = [1, 1]} : vector<16x384xf32> to vector<16x32xf32>
    %cst_21 = arith.constant 0.176776692 : f32
    %58 = vector.broadcast %cst_21 : f32 to vector<16x32xf32>
    %59 = arith.mulf %57, %58 : vector<16x32xf32>
    %60 = vector.shape_cast %59 : vector<16x32xf32> to vector<2x8x32xf32>
    %61 = arith.truncf %60 : vector<2x8x32xf32> to vector<2x8x32xbf16>
    %62 = vector.extract_strided_slice %31 {offsets = [0, 160], sizes = [16, 32], strides = [1, 1]} : vector<16x384xf32> to vector<16x32xf32>
    %63 = vector.shape_cast %62 : vector<16x32xf32> to vector<2x8x32xf32>
    %64 = arith.truncf %63 : vector<2x8x32xf32> to vector<2x8x32xbf16>
    %65 = vector.extract_strided_slice %31 {offsets = [0, 288], sizes = [16, 32], strides = [1, 1]} : vector<16x384xf32> to vector<16x32xf32>
    %66 = vector.shape_cast %65 : vector<16x32xf32> to vector<2x8x32xf32>
    %67 = arith.truncf %66 : vector<2x8x32xf32> to vector<2x8x32xbf16>
    "tpu.trace_start"() <{level = 10 : i32, message = "bqd,bkd->bqk"}> : () -> ()
    %cst_22 = arith.constant dense<0.000000e+00> : vector<2x8x8xf32>
    %68 = tpu.matmul %61, %64, %cst_22 {dimension_numbers = #tpu.dot_dimension_numbers<[2], [2], [1], [1], [0, 0, 0, 1, 1, 1], [0], [0]>} : vector<2x8x32xbf16>, vector<2x8x32xbf16>, vector<2x8x8xf32> -> vector<2x8x8xf32>
    "tpu.trace_stop"() : () -> ()
    %cst_23 = arith.constant dense<0xFF800000> : vector<2x8xf32>
    %69 = vector.multi_reduction <maximumf>, %68, %cst_23 [2] : vector<2x8x8xf32> to vector<2x8xf32>
    %70 = vector.shape_cast %69 : vector<2x8xf32> to vector<2x8x1xf32>
    %71 = vector.broadcast %70 : vector<2x8x1xf32> to vector<2x8x8xf32>
    %72 = arith.subf %68, %71 : vector<2x8x8xf32>
    %73 = math.exp %72 : vector<2x8x8xf32>
    %cst_24 = arith.constant dense<0.000000e+00> : vector<2x8xf32>
    %74 = vector.multi_reduction <add>, %73, %cst_24 [2] : vector<2x8x8xf32> to vector<2x8xf32>
    %75 = vector.shape_cast %74 : vector<2x8xf32> to vector<2x8x1xf32>
    %76 = tpu.reciprocal %75 {approx = true} : vector<2x8x1xf32> -> vector<2x8x1xf32>
    %77 = vector.broadcast %76 : vector<2x8x1xf32> to vector<2x8x8xf32>
    %78 = arith.mulf %73, %77 : vector<2x8x8xf32>
    %79 = arith.truncf %78 : vector<2x8x8xf32> to vector<2x8x8xbf16>
    "tpu.trace_start"() <{level = 10 : i32, message = "bqk,bkd->bqd"}> : () -> ()
    %cst_25 = arith.constant dense<0.000000e+00> : vector<2x8x32xf32>
    %80 = tpu.matmul %79, %67, %cst_25 {dimension_numbers = #tpu.dot_dimension_numbers<[2], [1], [1], [2], [0, 0, 0, 1, 1, 2], [0], [0]>} : vector<2x8x8xbf16>, vector<2x8x32xbf16>, vector<2x8x32xf32> -> vector<2x8x32xf32>
    "tpu.trace_stop"() : () -> ()
    %81 = vector.shape_cast %80 : vector<2x8x32xf32> to vector<16x32xf32>
    %82 = vector.extract_strided_slice %31 {offsets = [0, 64], sizes = [16, 32], strides = [1, 1]} : vector<16x384xf32> to vector<16x32xf32>
    %cst_26 = arith.constant 0.176776692 : f32
    %83 = vector.broadcast %cst_26 : f32 to vector<16x32xf32>
    %84 = arith.mulf %82, %83 : vector<16x32xf32>
    %85 = vector.shape_cast %84 : vector<16x32xf32> to vector<2x8x32xf32>
    %86 = arith.truncf %85 : vector<2x8x32xf32> to vector<2x8x32xbf16>
    %87 = vector.extract_strided_slice %31 {offsets = [0, 192], sizes = [16, 32], strides = [1, 1]} : vector<16x384xf32> to vector<16x32xf32>
    %88 = vector.shape_cast %87 : vector<16x32xf32> to vector<2x8x32xf32>
    %89 = arith.truncf %88 : vector<2x8x32xf32> to vector<2x8x32xbf16>
    %90 = vector.extract_strided_slice %31 {offsets = [0, 320], sizes = [16, 32], strides = [1, 1]} : vector<16x384xf32> to vector<16x32xf32>
    %91 = vector.shape_cast %90 : vector<16x32xf32> to vector<2x8x32xf32>
    %92 = arith.truncf %91 : vector<2x8x32xf32> to vector<2x8x32xbf16>
    "tpu.trace_start"() <{level = 10 : i32, message = "bqd,bkd->bqk"}> : () -> ()
    %cst_27 = arith.constant dense<0.000000e+00> : vector<2x8x8xf32>
    %93 = tpu.matmul %86, %89, %cst_27 {dimension_numbers = #tpu.dot_dimension_numbers<[2], [2], [1], [1], [0, 0, 0, 1, 1, 1], [0], [0]>} : vector<2x8x32xbf16>, vector<2x8x32xbf16>, vector<2x8x8xf32> -> vector<2x8x8xf32>
    "tpu.trace_stop"() : () -> ()
    %cst_28 = arith.constant dense<0xFF800000> : vector<2x8xf32>
    %94 = vector.multi_reduction <maximumf>, %93, %cst_28 [2] : vector<2x8x8xf32> to vector<2x8xf32>
    %95 = vector.shape_cast %94 : vector<2x8xf32> to vector<2x8x1xf32>
    %96 = vector.broadcast %95 : vector<2x8x1xf32> to vector<2x8x8xf32>
    %97 = arith.subf %93, %96 : vector<2x8x8xf32>
    %98 = math.exp %97 : vector<2x8x8xf32>
    %cst_29 = arith.constant dense<0.000000e+00> : vector<2x8xf32>
    %99 = vector.multi_reduction <add>, %98, %cst_29 [2] : vector<2x8x8xf32> to vector<2x8xf32>
    %100 = vector.shape_cast %99 : vector<2x8xf32> to vector<2x8x1xf32>
    %101 = tpu.reciprocal %100 {approx = true} : vector<2x8x1xf32> -> vector<2x8x1xf32>
    %102 = vector.broadcast %101 : vector<2x8x1xf32> to vector<2x8x8xf32>
    %103 = arith.mulf %98, %102 : vector<2x8x8xf32>
    %104 = arith.truncf %103 : vector<2x8x8xf32> to vector<2x8x8xbf16>
    "tpu.trace_start"() <{level = 10 : i32, message = "bqk,bkd->bqd"}> : () -> ()
    %cst_30 = arith.constant dense<0.000000e+00> : vector<2x8x32xf32>
    %105 = tpu.matmul %104, %92, %cst_30 {dimension_numbers = #tpu.dot_dimension_numbers<[2], [1], [1], [2], [0, 0, 0, 1, 1, 2], [0], [0]>} : vector<2x8x8xbf16>, vector<2x8x32xbf16>, vector<2x8x32xf32> -> vector<2x8x32xf32>
    "tpu.trace_stop"() : () -> ()
    %106 = vector.shape_cast %105 : vector<2x8x32xf32> to vector<16x32xf32>
    %107 = vector.extract_strided_slice %31 {offsets = [0, 96], sizes = [16, 32], strides = [1, 1]} : vector<16x384xf32> to vector<16x32xf32>
    %cst_31 = arith.constant 0.176776692 : f32
    %108 = vector.broadcast %cst_31 : f32 to vector<16x32xf32>
    %109 = arith.mulf %107, %108 : vector<16x32xf32>
    %110 = vector.shape_cast %109 : vector<16x32xf32> to vector<2x8x32xf32>
    %111 = arith.truncf %110 : vector<2x8x32xf32> to vector<2x8x32xbf16>
    %112 = vector.extract_strided_slice %31 {offsets = [0, 224], sizes = [16, 32], strides = [1, 1]} : vector<16x384xf32> to vector<16x32xf32>
    %113 = vector.shape_cast %112 : vector<16x32xf32> to vector<2x8x32xf32>
    %114 = arith.truncf %113 : vector<2x8x32xf32> to vector<2x8x32xbf16>
    %115 = vector.extract_strided_slice %31 {offsets = [0, 352], sizes = [16, 32], strides = [1, 1]} : vector<16x384xf32> to vector<16x32xf32>
    %116 = vector.shape_cast %115 : vector<16x32xf32> to vector<2x8x32xf32>
    %117 = arith.truncf %116 : vector<2x8x32xf32> to vector<2x8x32xbf16>
    "tpu.trace_start"() <{level = 10 : i32, message = "bqd,bkd->bqk"}> : () -> ()
    %cst_32 = arith.constant dense<0.000000e+00> : vector<2x8x8xf32>
    %118 = tpu.matmul %111, %114, %cst_32 {dimension_numbers = #tpu.dot_dimension_numbers<[2], [2], [1], [1], [0, 0, 0, 1, 1, 1], [0], [0]>} : vector<2x8x32xbf16>, vector<2x8x32xbf16>, vector<2x8x8xf32> -> vector<2x8x8xf32>
    "tpu.trace_stop"() : () -> ()
    %cst_33 = arith.constant dense<0xFF800000> : vector<2x8xf32>
    %119 = vector.multi_reduction <maximumf>, %118, %cst_33 [2] : vector<2x8x8xf32> to vector<2x8xf32>
    %120 = vector.shape_cast %119 : vector<2x8xf32> to vector<2x8x1xf32>
    %121 = vector.broadcast %120 : vector<2x8x1xf32> to vector<2x8x8xf32>
    %122 = arith.subf %118, %121 : vector<2x8x8xf32>
    %123 = math.exp %122 : vector<2x8x8xf32>
    %cst_34 = arith.constant dense<0.000000e+00> : vector<2x8xf32>
    %124 = vector.multi_reduction <add>, %123, %cst_34 [2] : vector<2x8x8xf32> to vector<2x8xf32>
    %125 = vector.shape_cast %124 : vector<2x8xf32> to vector<2x8x1xf32>
    %126 = tpu.reciprocal %125 {approx = true} : vector<2x8x1xf32> -> vector<2x8x1xf32>
    %127 = vector.broadcast %126 : vector<2x8x1xf32> to vector<2x8x8xf32>
    %128 = arith.mulf %123, %127 : vector<2x8x8xf32>
    %129 = arith.truncf %128 : vector<2x8x8xf32> to vector<2x8x8xbf16>
    "tpu.trace_start"() <{level = 10 : i32, message = "bqk,bkd->bqd"}> : () -> ()
    %cst_35 = arith.constant dense<0.000000e+00> : vector<2x8x32xf32>
    %130 = tpu.matmul %129, %117, %cst_35 {dimension_numbers = #tpu.dot_dimension_numbers<[2], [1], [1], [2], [0, 0, 0, 1, 1, 2], [0], [0]>} : vector<2x8x8xbf16>, vector<2x8x32xbf16>, vector<2x8x32xf32> -> vector<2x8x32xf32>
    "tpu.trace_stop"() : () -> ()
    %131 = vector.shape_cast %130 : vector<2x8x32xf32> to vector<16x32xf32>
    %132 = tpu.concatenate %56, %81, %106, %131 in 1 : vector<16x32xf32>, vector<16x32xf32>, vector<16x32xf32>, vector<16x32xf32> -> vector<16x128xf32>
    %133 = arith.truncf %132 : vector<16x128xf32> to vector<16x128xbf16>
    %c0_36 = arith.constant 0 : index
    %c0_37 = arith.constant 0 : index
    %c0_38 = arith.constant 0 : index
    %134 = vector.load %arg13[%c0_36, %c0_37, %c0_38] : memref<1x128x128xbf16, #tpu.memory_space<vmem>>, vector<1x128x128xbf16>
    %135 = vector.shape_cast %134 : vector<1x128x128xbf16> to vector<128x128xbf16>
    %cst_39 = arith.constant dense<0.000000e+00> : vector<16x128xf32>
    %136 = tpu.matmul %133, %135, %cst_39 {dimension_numbers = #tpu.dot_dimension_numbers<[1], [0], [0], [1], [0, 0, 1, 1], [], []>} : vector<16x128xbf16>, vector<128x128xbf16>, vector<16x128xf32> -> vector<16x128xf32>
    %137 = arith.addf %3, %136 : vector<16x128xf32>
    %c0_40 = arith.constant 0 : index
    %c0_41 = arith.constant 0 : index
    %c0_42 = arith.constant 0 : index
    %138 = vector.load %arg14[%c0_40, %c0_41, %c0_42] : memref<1x1x128xf32, #tpu.memory_space<vmem>>, vector<1x1x128xf32>
    %139 = vector.shape_cast %138 : vector<1x1x128xf32> to vector<1x128xf32>
    %140 = vector.broadcast %139 : vector<1x128xf32> to vector<16x128xf32>
    %141 = arith.addf %137, %140 : vector<16x128xf32>
    %c0_43 = arith.constant 0 : index
    %c0_44 = arith.constant 0 : index
    %c0_45 = arith.constant 0 : index
    %142 = vector.load %arg15[%c0_43, %c0_44, %c0_45] : memref<1x1x128xf32, #tpu.memory_space<vmem>>, vector<1x1x128xf32>
    %143 = vector.shape_cast %142 : vector<1x1x128xf32> to vector<1x128xf32>
    %c0_46 = arith.constant 0 : index
    %c0_47 = arith.constant 0 : index
    %c0_48 = arith.constant 0 : index
    %144 = vector.load %arg16[%c0_46, %c0_47, %c0_48] : memref<1x1x128xf32, #tpu.memory_space<vmem>>, vector<1x1x128xf32>
    %145 = vector.shape_cast %144 : vector<1x1x128xf32> to vector<1x128xf32>
    %cst_49 = arith.constant dense<0.000000e+00> : vector<16xf32>
    %146 = vector.multi_reduction <add>, %141, %cst_49 [1] : vector<16x128xf32> to vector<16xf32>
    %147 = vector.shape_cast %146 : vector<16xf32> to vector<16x1xf32>
    %cst_50 = arith.constant 1.280000e+02 : f32
    %148 = vector.broadcast %cst_50 : f32 to vector<16x1xf32>
    %149 = arith.divf %147, %148 : vector<16x1xf32>
    %150 = vector.broadcast %149 : vector<16x1xf32> to vector<16x128xf32>
    %151 = arith.subf %141, %150 : vector<16x128xf32>
    %152 = arith.mulf %151, %151 : vector<16x128xf32>
    %cst_51 = arith.constant dense<0.000000e+00> : vector<16xf32>
    %153 = vector.multi_reduction <add>, %152, %cst_51 [1] : vector<16x128xf32> to vector<16xf32>
    %154 = vector.shape_cast %153 : vector<16xf32> to vector<16x1xf32>
    %cst_52 = arith.constant 1.280000e+02 : f32
    %155 = vector.broadcast %cst_52 : f32 to vector<16x1xf32>
    %156 = arith.divf %154, %155 : vector<16x1xf32>
    %cst_53 = arith.constant 9.99999974E-6 : f32
    %157 = vector.broadcast %cst_53 : f32 to vector<16x1xf32>
    %158 = arith.addf %156, %157 : vector<16x1xf32>
    %159 = math.rsqrt %158 : vector<16x1xf32>
    %160 = vector.broadcast %159 : vector<16x1xf32> to vector<16x128xf32>
    %161 = arith.mulf %151, %160 : vector<16x128xf32>
    %162 = vector.broadcast %143 : vector<1x128xf32> to vector<16x128xf32>
    %163 = arith.mulf %161, %162 : vector<16x128xf32>
    %164 = vector.broadcast %145 : vector<1x128xf32> to vector<16x128xf32>
    %165 = arith.addf %163, %164 : vector<16x128xf32>
    %166 = arith.truncf %165 : vector<16x128xf32> to vector<16x128xbf16>
    %c0_54 = arith.constant 0 : index
    %c0_55 = arith.constant 0 : index
    %c0_56 = arith.constant 0 : index
    %167 = vector.load %arg17[%c0_54, %c0_55, %c0_56] : memref<1x128x256xbf16, #tpu.memory_space<vmem>>, vector<1x128x256xbf16>
    %168 = vector.shape_cast %167 : vector<1x128x256xbf16> to vector<128x256xbf16>
    %cst_57 = arith.constant dense<0.000000e+00> : vector<16x256xf32>
    %169 = tpu.matmul %166, %168, %cst_57 {dimension_numbers = #tpu.dot_dimension_numbers<[1], [0], [0], [1], [0, 0, 1, 1], [], []>} : vector<16x128xbf16>, vector<128x256xbf16>, vector<16x256xf32> -> vector<16x256xf32>
    %c0_58 = arith.constant 0 : index
    %c0_59 = arith.constant 0 : index
    %c0_60 = arith.constant 0 : index
    %170 = vector.load %arg18[%c0_58, %c0_59, %c0_60] : memref<1x1x256xf32, #tpu.memory_space<vmem>>, vector<1x1x256xf32>
    %171 = vector.shape_cast %170 : vector<1x1x256xf32> to vector<1x256xf32>
    %172 = vector.broadcast %171 : vector<1x256xf32> to vector<16x256xf32>
    %173 = arith.addf %169, %172 : vector<16x256xf32>
    %cst_61 = arith.constant 5.000000e-01 : f32
    %174 = vector.broadcast %cst_61 : f32 to vector<16x256xf32>
    %175 = arith.mulf %174, %173 : vector<16x256xf32>
    %cst_62 = arith.constant 4.471500e-02 : f32
    %176 = vector.broadcast %cst_62 : f32 to vector<16x256xf32>
    %177 = arith.mulf %176, %173 : vector<16x256xf32>
    %178 = arith.mulf %177, %173 : vector<16x256xf32>
    %179 = arith.mulf %178, %173 : vector<16x256xf32>
    %180 = arith.addf %173, %179 : vector<16x256xf32>
    %cst_63 = arith.constant 0.797884583 : f32
    %181 = vector.broadcast %cst_63 : f32 to vector<16x256xf32>
    %182 = arith.mulf %181, %180 : vector<16x256xf32>
    %183 = math.tanh %182 : vector<16x256xf32>
    %cst_64 = arith.constant 1.000000e+00 : f32
    %184 = vector.broadcast %cst_64 : f32 to vector<16x256xf32>
    %185 = arith.addf %184, %183 : vector<16x256xf32>
    %186 = arith.mulf %175, %185 : vector<16x256xf32>
    %187 = arith.truncf %186 : vector<16x256xf32> to vector<16x256xbf16>
    %c0_65 = arith.constant 0 : index
    %c0_66 = arith.constant 0 : index
    %c0_67 = arith.constant 0 : index
    %188 = vector.load %arg19[%c0_65, %c0_66, %c0_67] : memref<1x256x128xbf16, #tpu.memory_space<vmem>>, vector<1x256x128xbf16>
    %189 = vector.shape_cast %188 : vector<1x256x128xbf16> to vector<256x128xbf16>
    %cst_68 = arith.constant dense<0.000000e+00> : vector<16x128xf32>
    %190 = tpu.matmul %187, %189, %cst_68 {dimension_numbers = #tpu.dot_dimension_numbers<[1], [0], [0], [1], [0, 0, 1, 1], [], []>} : vector<16x256xbf16>, vector<256x128xbf16>, vector<16x128xf32> -> vector<16x128xf32>
    %191 = arith.addf %141, %190 : vector<16x128xf32>
    %c0_69 = arith.constant 0 : index
    %c0_70 = arith.constant 0 : index
    %c0_71 = arith.constant 0 : index
    %192 = vector.load %arg20[%c0_69, %c0_70, %c0_71] : memref<1x1x128xf32, #tpu.memory_space<vmem>>, vector<1x1x128xf32>
    %193 = vector.shape_cast %192 : vector<1x1x128xf32> to vector<1x128xf32>
    %194 = vector.broadcast %193 : vector<1x128xf32> to vector<16x128xf32>
    %195 = arith.addf %191, %194 : vector<16x128xf32>
    %c0_72 = arith.constant 0 : index
    %c0_73 = arith.constant 0 : index
    %196 = vector.load %arg26[%c0_72, %c0_73] : memref<16x128xf32, #tpu.memory_space<vmem>>, vector<16x128xf32>
    tpu.vector_store %arg26[%c0_72, %c0_73], %195 {strides = array<i32>} : memref<16x128xf32, #tpu.memory_space<vmem>>, vector<16x128xf32>,
    %c1_i32 = arith.constant 1 : i32
    %197 = arith.cmpi eq, %arg0, %c1_i32 : i32
    %198 = arith.extui %197 : i1 to i32
    %c0_i32_74 = arith.constant 0 : i32
    %199 = arith.cmpi ne, %198, %c0_i32_74 : i32
    scf.if %199 {
      %c0_75 = arith.constant 0 : index
      %c0_76 = arith.constant 0 : index
      %200 = vector.load %arg21[%c0_75, %c0_76] : memref<1x128xf32, #tpu.memory_space<vmem>>, vector<1x128xf32>
      %c0_77 = arith.constant 0 : index
      %c0_78 = arith.constant 0 : index
      %201 = vector.load %arg22[%c0_77, %c0_78] : memref<1x128xf32, #tpu.memory_space<vmem>>, vector<1x128xf32>
      %cst_79 = arith.constant dense<0.000000e+00> : vector<16xf32>
      %202 = vector.multi_reduction <add>, %195, %cst_79 [1] : vector<16x128xf32> to vector<16xf32>
      %203 = vector.shape_cast %202 : vector<16xf32> to vector<16x1xf32>
      %cst_80 = arith.constant 1.280000e+02 : f32
      %204 = vector.broadcast %cst_80 : f32 to vector<16x1xf32>
      %205 = arith.divf %203, %204 : vector<16x1xf32>
      %206 = vector.broadcast %205 : vector<16x1xf32> to vector<16x128xf32>
      %207 = arith.subf %195, %206 : vector<16x128xf32>
      %208 = arith.mulf %207, %207 : vector<16x128xf32>
      %cst_81 = arith.constant dense<0.000000e+00> : vector<16xf32>
      %209 = vector.multi_reduction <add>, %208, %cst_81 [1] : vector<16x128xf32> to vector<16xf32>
      %210 = vector.shape_cast %209 : vector<16xf32> to vector<16x1xf32>
      %cst_82 = arith.constant 1.280000e+02 : f32
      %211 = vector.broadcast %cst_82 : f32 to vector<16x1xf32>
      %212 = arith.divf %210, %211 : vector<16x1xf32>
      %cst_83 = arith.constant 9.99999974E-6 : f32
      %213 = vector.broadcast %cst_83 : f32 to vector<16x1xf32>
      %214 = arith.addf %212, %213 : vector<16x1xf32>
      %215 = math.rsqrt %214 : vector<16x1xf32>
      %216 = vector.broadcast %215 : vector<16x1xf32> to vector<16x128xf32>
      %217 = arith.mulf %207, %216 : vector<16x128xf32>
      %218 = vector.broadcast %200 : vector<1x128xf32> to vector<16x128xf32>
      %219 = arith.mulf %217, %218 : vector<16x128xf32>
      %220 = vector.broadcast %201 : vector<1x128xf32> to vector<16x128xf32>
      %221 = arith.addf %219, %220 : vector<16x128xf32>
      %222 = arith.truncf %221 : vector<16x128xf32> to vector<16x128xbf16>
      %c0_84 = arith.constant 0 : index
      %c0_85 = arith.constant 0 : index
      %223 = vector.load %arg23[%c0_84, %c0_85] : memref<128x256xbf16, #tpu.memory_space<vmem>>, vector<128x256xbf16>
      %cst_86 = arith.constant dense<0.000000e+00> : vector<16x256xf32>
      %224 = tpu.matmul %222, %223, %cst_86 {dimension_numbers = #tpu.dot_dimension_numbers<[1], [0], [0], [1], [0, 0, 1, 1], [], []>} : vector<16x128xbf16>, vector<128x256xbf16>, vector<16x256xf32> -> vector<16x256xf32>
      %c0_87 = arith.constant 0 : index
      %c0_88 = arith.constant 0 : index
      %225 = vector.load %arg24[%c0_87, %c0_88] : memref<1x256xf32, #tpu.memory_space<vmem>>, vector<1x256xf32>
      %226 = vector.broadcast %225 : vector<1x256xf32> to vector<16x256xf32>
      %227 = arith.addf %224, %226 : vector<16x256xf32>
      %c0_89 = arith.constant 0 : index
      %c0_90 = arith.constant 0 : index
      %228 = vector.load %arg25[%c0_89, %c0_90] : memref<16x256xf32, #tpu.memory_space<vmem>>, vector<16x256xf32>
      tpu.vector_store %arg25[%c0_89, %c0_90], %227 {strides = array<i32>} : memref<16x256xf32, #tpu.memory_space<vmem>>, vector<16x256xf32>,
    } else {
    }
    return
  }
  func.func @transform_0(%arg0: i32) -> (i32, i32) {
    %c0_i32 = arith.constant 0 : i32
    %c0_i32_0 = arith.constant 0 : i32
    %c0_i32_1 = arith.constant 0 : i32
    return %c0_i32, %c0_i32_0 : i32, i32
  }
  func.func @transform_1(%arg0: i32) -> (i32, i32) {
    %c0_i32 = arith.constant 0 : i32
    %c0_i32_0 = arith.constant 0 : i32
    %c0_i32_1 = arith.constant 0 : i32
    return %c0_i32, %c0_i32_0 : i32, i32
  }
  func.func @transform_2(%arg0: i32) -> (i32, i32) {
    %c0_i32 = arith.constant 0 : i32
    %c0_i32_0 = arith.constant 0 : i32
    %c0_i32_1 = arith.constant 0 : i32
    return %c0_i32, %c0_i32_0 : i32, i32
  }
  func.func @transform_3(%arg0: i32) -> (i32, i32) {
    %c0_i32 = arith.constant 0 : i32
    %c0_i32_0 = arith.constant 0 : i32
    %c0_i32_1 = arith.constant 0 : i32
    return %c0_i32, %c0_i32_0 : i32, i32
  }
  func.func @transform_4(%arg0: i32) -> (i32, i32) {
    %c0_i32 = arith.constant 0 : i32
    %c0_i32_0 = arith.constant 0 : i32
    %c0_i32_1 = arith.constant 0 : i32
    return %c0_i32, %c0_i32_0 : i32, i32
  }
  func.func @transform_5(%arg0: i32) -> (i32, i32) {
    %c0_i32 = arith.constant 0 : i32
    %c0_i32_0 = arith.constant 0 : i32
    %c0_i32_1 = arith.constant 0 : i32
    return %c0_i32, %c0_i32_0 : i32, i32
  }
  func.func @transform_6(%arg0: i32) -> (i32, i32) {
    %c0_i32 = arith.constant 0 : i32
    %c0_i32_0 = arith.constant 0 : i32
    %c0_i32_1 = arith.constant 0 : i32
    return %c0_i32, %c0_i32_0 : i32, i32
  }
  func.func @transform_7(%arg0: i32) -> (i32, i32) {
    %c0_i32 = arith.constant 0 : i32
    %c0_i32_0 = arith.constant 0 : i32
    %c0_i32_1 = arith.constant 0 : i32
    return %c0_i32, %c0_i32_0 : i32, i32
  }
  func.func @transform_8(%arg0: i32) -> (i32, i32) {
    %c0_i32 = arith.constant 0 : i32
    %c0_i32_0 = arith.constant 0 : i32
    %c0_i32_1 = arith.constant 0 : i32
    return %c0_i32, %c0_i32_0 : i32, i32
  }
  func.func @transform_9(%arg0: i32) -> (i32, i32, i32) {
    %c0_i32 = arith.constant 0 : i32
    %c0_i32_0 = arith.constant 0 : i32
    %c0_i32_1 = arith.constant 0 : i32
    return %arg0, %c0_i32, %c0_i32_0 : i32, i32, i32
  }
  func.func @transform_10(%arg0: i32) -> (i32, i32, i32) {
    %c0_i32 = arith.constant 0 : i32
    %c0_i32_0 = arith.constant 0 : i32
    %c0_i32_1 = arith.constant 0 : i32
    return %arg0, %c0_i32, %c0_i32_0 : i32, i32, i32
  }
  func.func @transform_11(%arg0: i32) -> (i32, i32, i32) {
    %c0_i32 = arith.constant 0 : i32
    %c0_i32_0 = arith.constant 0 : i32
    %c0_i32_1 = arith.constant 0 : i32
    return %arg0, %c0_i32, %c0_i32_0 : i32, i32, i32
  }
  func.func @transform_12(%arg0: i32) -> (i32, i32, i32) {
    %c0_i32 = arith.constant 0 : i32
    %c0_i32_0 = arith.constant 0 : i32
    %c0_i32_1 = arith.constant 0 : i32
    return %arg0, %c0_i32, %c0_i32_0 : i32, i32, i32
  }
  func.func @transform_13(%arg0: i32) -> (i32, i32, i32) {
    %c0_i32 = arith.constant 0 : i32
    %c0_i32_0 = arith.constant 0 : i32
    %c0_i32_1 = arith.constant 0 : i32
    return %arg0, %c0_i32, %c0_i32_0 : i32, i32, i32
  }
  func.func @transform_14(%arg0: i32) -> (i32, i32, i32) {
    %c0_i32 = arith.constant 0 : i32
    %c0_i32_0 = arith.constant 0 : i32
    %c0_i32_1 = arith.constant 0 : i32
    return %arg0, %c0_i32, %c0_i32_0 : i32, i32, i32
  }
  func.func @transform_15(%arg0: i32) -> (i32, i32, i32) {
    %c0_i32 = arith.constant 0 : i32
    %c0_i32_0 = arith.constant 0 : i32
    %c0_i32_1 = arith.constant 0 : i32
    return %arg0, %c0_i32, %c0_i32_0 : i32, i32, i32
  }
  func.func @transform_16(%arg0: i32) -> (i32, i32, i32) {
    %c0_i32 = arith.constant 0 : i32
    %c0_i32_0 = arith.constant 0 : i32
    %c0_i32_1 = arith.constant 0 : i32
    return %arg0, %c0_i32, %c0_i32_0 : i32, i32, i32
  }
  func.func @transform_17(%arg0: i32) -> (i32, i32, i32) {
    %c0_i32 = arith.constant 0 : i32
    %c0_i32_0 = arith.constant 0 : i32
    %c0_i32_1 = arith.constant 0 : i32
    return %arg0, %c0_i32, %c0_i32_0 : i32, i32, i32
  }
  func.func @transform_18(%arg0: i32) -> (i32, i32, i32) {
    %c0_i32 = arith.constant 0 : i32
    %c0_i32_0 = arith.constant 0 : i32
    %c0_i32_1 = arith.constant 0 : i32
    return %arg0, %c0_i32, %c0_i32_0 : i32, i32, i32
  }
  func.func @transform_19(%arg0: i32) -> (i32, i32, i32) {
    %c0_i32 = arith.constant 0 : i32
    %c0_i32_0 = arith.constant 0 : i32
    %c0_i32_1 = arith.constant 0 : i32
    return %arg0, %c0_i32, %c0_i32_0 : i32, i32, i32
  }
  func.func @transform_20(%arg0: i32) -> (i32, i32) {
    %c0_i32 = arith.constant 0 : i32
    %c0_i32_0 = arith.constant 0 : i32
    %c0_i32_1 = arith.constant 0 : i32
    return %c0_i32, %c0_i32_0 : i32, i32
  }
  func.func @transform_21(%arg0: i32) -> (i32, i32) {
    %c0_i32 = arith.constant 0 : i32
    %c0_i32_0 = arith.constant 0 : i32
    %c0_i32_1 = arith.constant 0 : i32
    return %c0_i32, %c0_i32_0 : i32, i32
  }
  func.func @transform_22(%arg0: i32) -> (i32, i32) {
    %c0_i32 = arith.constant 0 : i32
    %c0_i32_0 = arith.constant 0 : i32
    %c0_i32_1 = arith.constant 0 : i32
    return %c0_i32, %c0_i32_0 : i32, i32
  }
  func.func @transform_23(%arg0: i32) -> (i32, i32) {
    %c0_i32 = arith.constant 0 : i32
    %c0_i32_0 = arith.constant 0 : i32
    %c0_i32_1 = arith.constant 0 : i32
    return %c0_i32, %c0_i32_0 : i32, i32
  }
  func.func @transform_24(%arg0: i32) -> (i32, i32) {
    %c0_i32 = arith.constant 0 : i32
    %c0_i32_0 = arith.constant 0 : i32
    %c0_i32_1 = arith.constant 0 : i32
    return %c0_i32, %c0_i32_0 : i32, i32
  }
}

</mosaic_0001>

<bundles_post_ra>
// kernel: _lambda_.1
= control target key start
LH: loop header
LB: loop body
LE: loop exit
PB: predicated region body
PF: predicated region fallthrough
CT: control target
= control target key end

     0   :  { %s4981_s0 = inlined_call_operand.vmem [shape: bf16[16,256], index: 0, kind: input, shape index: {}]   ;;  %s4982_s1 = inlined_call_operand.vmem [shape: f32[16,128], index: 1, kind: input, shape index: {}]   ;;  %s4983_s2 = inlined_call_operand.vmem [shape: bf16[16,128], index: 2, kind: input, shape index: {}]   ;;  %s4984_s3 = inlined_call_operand.vmem [shape: bf16[256,128], index: 3, kind: input, shape index: {}]   ;;  %s4985_s4 = inlined_call_operand.vmem [shape: f32[1,128], index: 4, kind: input, shape index: {}]   ;;  %s4986_s5 = inlined_call_operand.vmem [shape: bf16[128,256], index: 5, kind: input, shape index: {}]   ;;  %s4987_s6 = inlined_call_operand.vmem [shape: f32[1,256], index: 6, kind: input, shape index: {}]   ;;  %s4988_s7 = inlined_call_operand.vmem [shape: bf16[256,128], index: 7, kind: input, shape index: {}]   ;;  %s4989_s8 = inlined_call_operand.vmem [shape: f32[1,128], index: 8, kind: input, shape index: {}]   ;;  %s4990_s9 = inlined_call_operand.vmem [shape: f32[2,1,128], index: 9, kind: input, shape index: {}]   ;;  %s4991_s10 = inlined_call_operand.vmem [shape: f32[2,1,128], index: 10, kind: input, shape index: {}]   ;;  %s4992_s11 = inlined_call_operand.vmem [shape: bf16[2,128,384], index: 11, kind: input, shape index: {}]   ;;  %s4993_s12 = inlined_call_operand.vmem [shape: bf16[2,128,128], index: 12, kind: input, shape index: {}]   ;;  %s4994_s13 = inlined_call_operand.vmem [shape: f32[2,1,128], index: 13, kind: input, shape index: {}]   ;;  %s4995_s14 = inlined_call_operand.vmem [shape: f32[2,1,128], index: 14, kind: input, shape index: {}]   ;;  %s4996_s15 = inlined_call_operand.vmem [shape: f32[2,1,128], index: 15, kind: input, shape index: {}]   ;;  %s4997_s16 = inlined_call_operand.vmem [shape: bf16[2,128,256], index: 16, kind: input, shape index: {}]   ;;  %s4998_s17 = inlined_call_operand.vmem [shape: f32[2,1,256], index: 17, kind: input, shape index: {}]   ;;  %s4999_s18 = inlined_call_operand.vmem [shape: bf16[2,256,128], index: 18, kind: input, shape index: {}]   ;;  %s5000_s19 = inlined_call_operand.vmem [shape: f32[2,1,128], index: 19, kind: input, shape index: {}]   ;;  %s5001_s20 = inlined_call_operand.vmem [shape: f32[1,128], index: 20, kind: input, shape index: {}]   ;;  %s5002_s21 = inlined_call_operand.vmem [shape: f32[1,128], index: 21, kind: input, shape index: {}]   ;;  %s5003_s22 = inlined_call_operand.vmem [shape: bf16[128,256], index: 22, kind: input, shape index: {}]   ;;  %s5004_s23 = inlined_call_operand.vmem [shape: f32[1,256], index: 23, kind: input, shape index: {}]   ;;  %s5005_s24 = inlined_call_operand.vmem [shape: f32[16,256], index: 24, kind: output, shape index: {}]  }
   0x1   :  { %5013 = sst [smem:[#allocation4_spill]] %s4981_s0 }
   0x2   :  { %5014 = sst [smem:[#allocation5_spill]] %s4982_s1 }
   0x3   :  { %5015 = sst [smem:[#allocation6_spill]] %s4983_s2 }
   0x4   :  { %5016 = sst [smem:[#allocation7_spill]] %s4984_s3 }
   0x5   :  { %5017 = sst [smem:[#allocation8_spill]] %s4985_s4 }
   0x6   :  { %5018 = sst [smem:[#allocation9_spill]] %s4986_s5  ;;  %s4349_s5 = smov 0  }
   0x7   :  { %5019 = sst [smem:[#allocation10_spill]] %s4987_s6 }
   0x8   :  { %5020 = sst [smem:[#allocation11_spill]] %s4988_s7 }
   0x9   :  { %5021 = sst [smem:[#allocation12_spill]] %s4989_s8 }
   0xa   :  { %5022 = sst [smem:[#allocation13_spill]] %s4992_s11 }
   0xb   :  { %5023 = sst [smem:[#allocation14_spill]] %s4993_s12 }
   0xc   :  { %5024 = sst [smem:[#allocation15_spill]] %s5001_s20 }
   0xd   :  { %5025 = sst [smem:[#allocation16_spill]] %s5002_s21 }
   0xe   :  { %5026 = sst [smem:[#allocation17_spill]] %s5004_s23 }
   0xf   :  { %5027 = sst [smem:[#allocation18_spill]] %s5005_s24 }
  0x10 LB: > { %5028 = sst [smem:[#allocation3_spill]] %s4214_s5  ;;  %s4355_s26 = sadd.s32 4294967295, %s4214_s5   ;;  %s4214_s5 = sphi %s4349_s5, %s34_s5  }
  0x11   : > { %p3525_p0 = scmp.ge.s32.totalorder %s4214_s5, 1  ;;  %p744_p1 = scmp.lt.s32.totalorder %s4214_s5, 3 }
  0x13   : > { %p745_p2 = pnand %p3525_p0, %p744_p1 }
  0x14   : > { %p842_p3 = scmp.lt.s32.totalorder (!%p745_p2), %s4355_s26, 1  ;;  %s5029_s12 = sld [smem:[#allocation14_spill]] (!%p745_p2) }
  0x15   : > { %748 = sbr.rel (%p745_p2) target bundleno = 4864 (0x1300), region = 116  ;;  %s5030_s11 = sld [smem:[#allocation13_spill]] (!%p745_p2) }
  0x16   : > { %p3534_p4 = scmp.ne.s32.totalorder (!%p745_p2), %s4355_s26, 0 }
  0x1a   : > { %s4361_s27 = scalar_select %p842_p3, %s4355_s26, 1 }
  0x1b   : > { %s5031_s20 = sld [smem:[#allocation9_spill]] (!%p3534_p4) }
  0x1c   : > { %s3950_s30 = smul.u32 192, %s4361_s27  ;;  %s3695_s3 = sshll.u32 %s4361_s27, 6 }
  0x1d   : > { %s4376_s4 = scalar_lea.vmem %s5029_s12, %s3695_s3  ;;  %s3696_s25 = sshll.u32 %s4361_s27, 7 }
  0x1e   : > { %s4385_s23 = scalar_lea.vmem %s5030_s11, %s3950_s30  ;;  %s4399_s12 = scalar_lea.vmem %s4997_s16, %s3696_s25 }
  0x1f   : > { %s3531_s1 = sshll.u32 %s4361_s27, 1  ;;  %s4410_s21 = scalar_lea.vmem %s4999_s18, %s3696_s25 }
  0x20   : > { %s4405_s24 = scalar_lea.vmem %s4998_s17, %s3531_s1  ;;  %888 = sbr.rel (%p3534_p4) target bundleno = 508 (0x1fc), region = 120 }
  0x21   : > { %s5032_s2 = sld [smem:[#allocation7_spill]] (!%p3534_p4) }
  0x22   : > { %s5033_s0 = sld [smem:[#allocation6_spill]] (!%p3534_p4) }
  0x23   : > { %s5034_s28 = sld [smem:[#allocation4_spill]] (!%p3534_p4) }
  0x24   : > { %s5035_s3 = sld [smem:[#allocation11_spill]] (!%p3534_p4) }
  0x25   : > { %v3967_v0 = vld [vmem:[%s5031_s20 + $0x74] ss:$8 sps:$4 sm:$0xff]   ;;  %v3969_v1 = vld [vmem:[%s5031_s20 + $0x70] ss:$8 sps:$4 sm:$0xff]   ;;  %v4216_v2 = vmov 0   ;;  %v1097_v52 = vlaneseq  ;;  %s5037_s1 = sld [smem:[#allocation8_spill]] }
  0x26   : > { %1225 = vmatprep.mubr.bf16.mxu1 %v4216_v2  ;;  %1193 = vmatprep.subr.bf16.mxu1 %v3967_v0  ;;  %v3970_v3 = vld [vmem:[%s5031_s20 + $0x64] ss:$8 sps:$4 sm:$0xff]   ;;  %v3972_v4 = vld [vmem:[%s5031_s20 + $0x60] ss:$8 sps:$4 sm:$0xff]   ;;  %v3973_v5 = vld [vmem:[%s5031_s20 + $0x54] ss:$8 sps:$4 sm:$0xff]  }
  0x27   : > { %1194 = vmatpush1.bf16.msra.mxu1 %v3969_v1  ;;  %v3975_v6 = vld [vmem:[%s5031_s20 + $0x50] ss:$8 sps:$4 sm:$0xff]   ;;  %v3976_v7 = vld [vmem:[%s5031_s20 + $0x44] ss:$8 sps:$4 sm:$0xff]   ;;  %v3978_v8 = vld [vmem:[%s5031_s20 + $0x40] ss:$8 sps:$4 sm:$0xff]  }
  0x28   : > { %1195 = vmatprep.subr.bf16.mxu1 %v3970_v3  ;;  %v3979_v9 = vld [vmem:[%s5031_s20 + $0x34] ss:$8 sps:$4 sm:$0xff]   ;;  %v3981_v11 = vld [vmem:[%s5031_s20 + $0x30] ss:$8 sps:$4 sm:$0xff]   ;;  %v3982_v13 = vld [vmem:[%s5031_s20 + $0x24] ss:$8 sps:$4 sm:$0xff]  }
  0x29   : > { %v3992_v10 = vld [vmem:[%s5032_s2 + $0x78] sm:$0xff]   ;;  %v3994_v14 = vld [vmem:[%s5032_s2 + $0x70] sm:$0xff]   ;;  %v3996_v16 = vld [vmem:[%s5032_s2 + $0x68] sm:$0xff]   ;;  %v1098_v53 = vshrl.u32 %v1097_v52, 7  ;;  %s5038_s29 = sld [smem:[#allocation5_spill]] }
  0x2a   : > { %v3993_v12 = vld [vmem:[%s5032_s2 + $0x38] sm:$0xff]   ;;  %3698 = vmatprep.subr.bf16.mxu0 %v3992_v10  ;;  %v3995_v15 = vld [vmem:[%s5032_s2 + $0x30] sm:$0xff]   ;;  %v3984_v17 = vld [vmem:[%s5031_s20 + $0x20] ss:$8 sps:$4 sm:$0xff]   ;;  %s5039_s8 = sld [smem:[#allocation12_spill]] }
  0x2b   : > { %1196 = vmatpush1.bf16.msra.mxu1 %v3972_v4  ;;  %3699 = vmatpush3.bf16.msra.mxu0 %v3993_v12  ;;  %v3985_v18 = vld [vmem:[%s5031_s20 + $0x14] ss:$8 sps:$4 sm:$0xff]   ;;  %v3997_v19 = vld [vmem:[%s5032_s2 + $0x28] sm:$0xff]   ;;  %v3998_v20 = vld [vmem:[%s5032_s2 + $0x60] sm:$0xff]   ;;  %v1099_v54 = vsub.s32 0, %v1098_v53  ;;  %v1103_v56 = vsub.s32 1, %v1098_v53 }
  0x2c   : > { %1197 = vmatprep.subr.bf16.mxu1 %v3973_v5  ;;  %3700 = vmatprep.subr.bf16.mxu0 %v3994_v14  ;;  %v3987_v21 = vld [vmem:[%s5031_s20 + $0x10] ss:$8 sps:$4 sm:$0xff]   ;;  %v3988_v22 = vld [vmem:[%s5031_s20 + $0x4] ss:$8 sps:$4 sm:$0xff]   ;;  %v3990_v25 = vld [vmem:[%s5031_s20] ss:$8 sps:$4 sm:$0xff]  }
  0x2d   : > { %v3999_v23 = vld [vmem:[%s5032_s2 + $0x20] sm:$0xff]   ;;  %v4000_v24 = vld [vmem:[%s5032_s2 + $0x58] sm:$0xff]   ;;  %v4002_v27 = vld [vmem:[%s5032_s2 + $0x50] sm:$0xff]  }
  0x2e   : > { %v4001_v26 = vld [vmem:[%s5032_s2 + $0x18] sm:$0xff]   ;;  %v3991_v28 = vld [vmem:[%s5033_s0] sm:$0xff]   ;;  %v4003_v29 = vld [vmem:[%s5032_s2 + $0x10] sm:$0xff]   ;;  %s5036_s0 = sld [smem:[#allocation10_spill]] }
  0x2f   : > { %1198 = vmatpush1.bf16.msra.mxu1 %v3975_v6  ;;  %3701 = vmatpush3.bf16.msra.mxu0 %v3995_v15  ;;  %v4004_v30 = vld [vmem:[%s5032_s2 + $0x48] sm:$0xff]   ;;  %v4006_v32 = vld [vmem:[%s5032_s2 + $0x40] sm:$0xff]   ;;  %v4011_v36 = vld [vmem:[%s5035_s3 + $0x78] sm:$0xff]  }
  0x30   : > { %1199 = vmatprep.subr.bf16.mxu1 %v3976_v7  ;;  %3702 = vmatprep.subr.bf16.mxu0 %v3996_v16  ;;  %v4005_v31 = vld [vmem:[%s5032_s2 + $0x8] sm:$0xff]   ;;  %v4007_v33 = vld [vmem:[%s5032_s2] sm:$0xff]   ;;  %v4012_v37 = vld [vmem:[%s5035_s3 + $0x38] sm:$0xff]  }
  0x31   : > { %v4010_v34 = vld [vmem:[%s5034_s28 + $0x4] ss:$8 sps:$4 sm:$0xff]   ;;  %v4008_v35 = vld [vmem:[%s5034_s28] ss:$8 sps:$4 sm:$0xff]   ;;  %v4013_v38 = vld [vmem:[%s5035_s3 + $0x70] sm:$0xff]  }
  0x32   : > { %1068 = vmatprep.mubr.bf16.mxu0 %v4010_v34  ;;  %v4014_v39 = vld [vmem:[%s5035_s3 + $0x30] sm:$0xff]   ;;  %v4015_v40 = vld [vmem:[%s5035_s3 + $0x68] sm:$0xff]   ;;  %v4017_v42 = vld [vmem:[%s5035_s3 + $0x60] sm:$0xff]  }
  0x33   : > { %1200 = vmatpush1.bf16.msra.mxu1 %v3978_v8  ;;  %3703 = vmatpush3.bf16.msra.mxu0 %v3997_v19  ;;  %v4016_v41 = vld [vmem:[%s5035_s3 + $0x28] sm:$0xff]   ;;  %v4018_v43 = vld [vmem:[%s5035_s3 + $0x20] sm:$0xff]   ;;  %v4019_v44 = vld [vmem:[%s5035_s3 + $0x58] sm:$0xff]  }
  0x34   : > { %1201 = vmatprep.subr.bf16.mxu1 %v3979_v9  ;;  %3704 = vmatprep.subr.bf16.mxu0 %v3998_v20  ;;  %v4020_v45 = vld [vmem:[%s5035_s3 + $0x18] sm:$0xff]   ;;  %v4021_v46 = vld [vmem:[%s5035_s3 + $0x50] sm:$0xff]   ;;  %v4023_v48 = vld [vmem:[%s5035_s3 + $0x48] sm:$0xff]  }
  0x35   : > { %v4022_v47 = vld [vmem:[%s5035_s3 + $0x10] sm:$0xff]   ;;  %v4024_v49 = vld [vmem:[%s5035_s3 + $0x8] sm:$0xff]   ;;  %v4025_v50 = vld [vmem:[%s5035_s3 + $0x40] sm:$0xff]  }
  0x36   : > { %v4026_v51 = vld [vmem:[%s5035_s3] sm:$0xff]  }
  0x37   : > { %1202 = vmatpush1.bf16.msra.mxu1 %v3981_v11  ;;  %3705 = vmatpush3.bf16.msra.mxu0 %v3999_v23  ;;  %v1095_v55 = vld [vmem:[%s5036_s0] sm:$0x3] }
  0x38   : > { %1203 = vmatprep.subr.bf16.mxu1 %v3982_v13  ;;  %3706 = vmatprep.subr.bf16.mxu0 %v4000_v24  ;;  %v1100_v57 = vrot.slane %v1095_v55, %v1099_v54  ;;  %v1104_v58 = vrot.slane %v1095_v55, %v1103_v56 }
  0x3b   : > { %1204 = vmatpush1.bf16.msra.mxu1 %v3984_v17  ;;  %3707 = vmatpush3.bf16.msra.mxu0 %v4001_v26 }
  0x3c   : > { %1205 = vmatprep.subr.bf16.mxu1 %v3985_v18  ;;  %3708 = vmatprep.subr.bf16.mxu0 %v4002_v27 }
  0x3f   : > { %1206 = vmatpush1.bf16.msra.mxu1 %v3987_v21  ;;  %3709 = vmatpush3.bf16.msra.mxu0 %v4003_v29 }
  0x40   : > { %1207 = vmatprep.subr.bf16.mxu1 %v3988_v22  ;;  %3710 = vmatprep.subr.bf16.mxu0 %v4004_v30 }
  0x43   : > { %1208 = vmatpush1.bf16.msra.mxu1 %v3990_v25  ;;  %3711 = vmatpush3.bf16.msra.mxu0 %v4005_v31 }
  0x44   : > { %3712 = vmatprep.subr.bf16.mxu0 %v4006_v32 }
  0x46   : > { %1226 = vmatmul.mubr.bf16.vlgmr.msra.gmra.mxu1 %v3991_v28 }
  0x47   : > { %3713 = vmatpush3.bf16.msra.mxu0 %v4007_v33 }
  0x48   : > { %3720 = vmatprep.subr.bf16.mxu0 %v4011_v36 }
  0x4a   : > { %1069 = vmatmul.mubr.bf16.vlgmr.msra.gmra.mxu0 %v4008_v35 }
  0x4b   : > { %3721 = vmatpush3.bf16.msra.mxu0 %v4012_v37 }
  0x4c   : > { %3722 = vmatprep.subr.bf16.mxu0 %v4013_v38 }
  0x4f   : > { %3723 = vmatpush3.bf16.msra.mxu0 %v4014_v39 }
  0x50   : > { %3724 = vmatprep.subr.bf16.mxu0 %v4015_v40 }
  0x53   : > { %3725 = vmatpush3.bf16.msra.mxu0 %v4016_v41 }
  0x54   : > { %3726 = vmatprep.subr.bf16.mxu0 %v4017_v42 }
  0x57   : > { %3727 = vmatpush3.bf16.msra.mxu0 %v4018_v43 }
  0x58   : > { %3728 = vmatprep.subr.bf16.mxu0 %v4019_v44 }
  0x5b   : > { %3729 = vmatpush3.bf16.msra.mxu0 %v4020_v45  ;;  %v3535_v45 = vld [vmem:[%s5037_s1] ss:$0 sm:$0xff] }
  0x5c   : > { %3730 = vmatprep.subr.bf16.mxu0 %v4021_v46 }
  0x5f   : > { %3731 = vmatpush3.bf16.msra.mxu0 %v4022_v47 }
  0x60   : > { %3732 = vmatprep.subr.bf16.mxu0 %v4023_v48 }
  0x63   : > { %3733 = vmatpush3.bf16.msra.mxu0 %v4024_v49 }
  0x64   : > { %3734 = vmatprep.subr.bf16.mxu0 %v4025_v50  ;;  %v1450_v50 = vld [vmem:[%s5038_s29] sm:$0xff] }
  0x67   : > { %3735 = vmatpush3.bf16.msra.mxu0 %v4026_v51  ;;  %v3571_v51 = vld [vmem:[%s5039_s8] ss:$0 sm:$0xff] }
 0x106   : > { %v1227_v59 = vpop.f32.mrf.mxu1 }
 0x107   : > { %v1228_v60 = vadd.f32 %v1227_v59, %v1100_v57 }
 0x108   : > { %v1229_v61 = vpop.f32.mrf.mxu1 }
 0x109   : > { %v1240_v62 = vmul.f32 0.044715, %v1228_v60  ;;  %v1230_v63 = vadd.f32 %v1229_v61, %v1104_v58  ;;  %v1236_v34 = vmul.f32 0.5, %v1228_v60 }
 0x10a   : > { %v1231_v0 = vpop.f32.mrf.mxu1  ;;  %v3714_v41 = vpop.f32.mrf.mxu0 }
 0x10b   : > { %v1244_v1 = vmul.f32 %v1240_v62, %v1228_v60  ;;  %v1241_v2 = vmul.f32 0.044715, %v1230_v63  ;;  %v1232_v3 = vadd.f32 %v1231_v0, %v1100_v57  ;;  %v1237_v31 = vmul.f32 0.5, %v1230_v63 }
 0x10c   : > { %v1233_v4 = vpop.f32.mrf.mxu1  ;;  %v3715_v42 = vpop.f32.mrf.mxu0 }
 0x10d   : > { %v1248_v5 = vmul.f32 %v1244_v1, %v1228_v60  ;;  %v1245_v6 = vmul.f32 %v1241_v2, %v1230_v63  ;;  %v1242_v7 = vmul.f32 0.044715, %v1232_v3  ;;  %v1234_v8 = vadd.f32 %v1233_v4, %v1104_v58  ;;  %v1451_v58 = vld [vmem:[%s5038_s29 + $0x8] sm:$0xff] }
 0x10e   : > { %v1238_v29 = vmul.f32 0.5, %v1232_v3  ;;  %v3717_v43 = vpop.f32.mrf.mxu0  ;;  %v3716_v44 = vadd.f32 %v3715_v42, %v3714_v41 }
 0x10f   : > { %v1252_v9 = vadd.f32 %v1248_v5, %v1228_v60  ;;  %v1249_v10 = vmul.f32 %v1245_v6, %v1230_v63  ;;  %v1246_v11 = vmul.f32 %v1242_v7, %v1232_v3  ;;  %v1243_v12 = vmul.f32 0.044715, %v1234_v8 }
 0x110   : > { %v1239_v32 = vmul.f32 0.5, %v1234_v8  ;;  %v3718_v46 = vpop.f32.mrf.mxu0  ;;  %v1071_v48 = vadd.f32 %v3716_v44, %v3535_v45 }
 0x111   : > { %v1250_v13 = vmul.f32 %v1246_v11, %v1232_v3  ;;  %v1247_v14 = vmul.f32 %v1243_v12, %v1234_v8  ;;  %v1253_v15 = vadd.f32 %v1249_v10, %v1230_v63  ;;  %v1256_v16 = vmul.f32 0.7978846, %v1252_v9 }
 0x112   : > { %v3719_v49 = vadd.f32 %v3718_v46, %v3717_v43  ;;  %v1452_v55 = vadd.f32 %v1450_v50, %v1071_v48 }
 0x113   : > { %v1254_v17 = vadd.f32 %v1250_v13, %v1232_v3  ;;  %v1251_v18 = vmul.f32 %v1247_v14, %v1234_v8  ;;  %v1257_v19 = vmul.f32 0.7978846, %v1253_v15 }
 0x114   : > { %v1074_v56 = vadd.f32 %v3719_v49, %v3535_v45 }
 0x115   : > { %v1258_v20 = vmul.f32 0.7978846, %v1254_v17  ;;  %v1255_v21 = vadd.f32 %v1251_v18, %v1234_v8  ;;  %4027 = vtanh.f32 %v1257_v19 }
 0x116   : > { %4029 = vtanh.f32 %v1256_v16  ;;  %v1453_v62 = vadd.f32 %v1451_v58, %v1074_v56 }
 0x117   : > { %4031 = vtanh.f32 %v1258_v20  ;;  %v1259_v22 = vmul.f32 0.7978846, %v1255_v21 }
 0x119   : > { %4033 = vtanh.f32 %v1259_v22 }
 0x122   : > { %v4028_v23 = vpop.eup %4027 }
 0x123   : > { %v4030_v24 = vpop.eup %4029  ;;  %v1265_v26 = vadd.f32 1.0, %v4028_v23 }
 0x124   : > { %v4032_v25 = vpop.eup %4031  ;;  %v1264_v30 = vadd.f32 1.0, %v4030_v24 }
 0x125   : > { %v1266_v27 = vadd.f32 1.0, %v4032_v25  ;;  %v1269_v36 = vmul.f32 %v1265_v26, %v1237_v31 }
 0x126   : > { %v4034_v28 = vpop.eup %4033  ;;  %v1268_v38 = vmul.f32 %v1264_v30, %v1236_v34 }
 0x127   : > { %v1267_v33 = vadd.f32 1.0, %v4034_v28  ;;  %v1270_v35 = vmul.f32 %v1266_v27, %v1238_v29 }
 0x129   : > { %v1271_v37 = vmul.f32 %v1267_v33, %v1239_v32  ;;  %v1272_v40 = vpack.c.bf16 %v1270_v35, %v1268_v38 }
 0x12b   : > { %v1273_v39 = vpack.c.bf16 %v1271_v37, %v1269_v36 }
 0x12d   : > { %1441 = vmatprep.mubr.bf16.mxu0 %v1273_v39 }
 0x12e   : > { %1442 = vmatmul.mubr.bf16.vlgmr.msra.gmra.mxu0 %v1272_v40 }
 0x1ee   : > { %v3736_v47 = vpop.f32.mrf.mxu0 }
 0x1f0   : > { %v3737_v52 = vpop.f32.mrf.mxu0 }
 0x1f1   : > { %v3738_v53 = vadd.f32 %v3737_v52, %v3736_v47 }
 0x1f2   : > { %v3739_v54 = vpop.f32.mrf.mxu0 }
 0x1f3   : > { %v1444_v57 = vadd.f32 %v3738_v53, %v3571_v51 }
 0x1f4   : > { %v3740_v59 = vpop.f32.mrf.mxu0 }
 0x1f5   : > { %v1454_v60 = vadd.f32 %v1452_v55, %v1444_v57  ;;  %v3741_v61 = vadd.f32 %v3740_v59, %v3739_v54 }
 0x1f7   : > { %1456 = vst [vmem:[#allocation2] sm:$0xff] %v1454_v60  ;;  %v1447_v63 = vadd.f32 %v3741_v61, %v3571_v51 }
 0x1f9   : > { %v1455_v0 = vadd.f32 %v1453_v62, %v1447_v63 }
 0x1fb   : > { %1457 = vst [vmem:[#allocation2 + $0x8] sm:$0xff] %v1455_v0 }
 0x1fc PF: > { %v4050_v3 = vld [vmem:[%s4385_s23 + $0xac] ss:$12 sps:$4 sm:$0xff]   ;;  %v4052_v4 = vld [vmem:[%s4385_s23 + $0xa8] ss:$12 sps:$4 sm:$0xff]   ;;  %v4217_v5 = vmov 0.0   ;;  %v4218_v28 = vmov 0   ;;  %s5040_s1 = scalar_lea.vmem %s4990_s9, %s4361_s27  ;;  %s5041_s7 = scalar_lea.vmem %s4991_s10, %s4361_s27 }
 0x1fd   : > { %3814 = vmatprep.subr.bf16.mxu1 %v4217_v5  ;;  %v4053_v6 = vld [vmem:[%s4385_s23 + $0xb0] ss:$12 sps:$4 sm:$0xff]   ;;  %1662 = vmatprep.subr.bf16.mxu0 %v4050_v3  ;;  %v4054_v15 = vld [vmem:[%s4385_s23 + $0x94] ss:$12 sps:$4 sm:$0xff]   ;;  %v4057_v17 = vld [vmem:[%s4385_s23 + $0x98] ss:$12 sps:$4 sm:$0xff]  }
 0x1fe   : > { %v1458_v1 = vld [vmem:[#allocation2] sm:$0xff]  ;;  %1663 = vmatpush1.bf16.msra.mxu0 %v4052_v4  ;;  %3815 = vmatpush3.bf16.msra.mxu1 %v4053_v6  ;;  %v4056_v16 = vld [vmem:[%s4385_s23 + $0x90] ss:$12 sps:$4 sm:$0xff]   ;;  %v4065_v23 = vld [vmem:[%s4385_s23 + $0x68] ss:$12 sps:$4 sm:$0xff]   ;;  %vm4219_vm0 = vmmov 0  }
 0x1ff   : > { %1462 = vadd.xlane.f32.xlu0 %v1458_v1  ;;  %3816 = vmatprep.subr.bf16.mxu1 %v4217_v5  ;;  %v4058_v18 = vld [vmem:[%s4385_s23 + $0x7c] ss:$12 sps:$4 sm:$0xff]   ;;  %v4060_v19 = vld [vmem:[%s4385_s23 + $0x78] ss:$12 sps:$4 sm:$0xff]   ;;  %v4061_v20 = vld [vmem:[%s4385_s23 + $0x80] ss:$12 sps:$4 sm:$0xff]  }
 0x200   : > { %1664 = vmatprep.subr.bf16.mxu0 %v4054_v15  ;;  %v4062_v21 = vld [vmem:[%s4385_s23 + $0x64] ss:$12 sps:$4 sm:$0xff]   ;;  %v4064_v22 = vld [vmem:[%s4385_s23 + $0x60] ss:$12 sps:$4 sm:$0xff]   ;;  %v4068_v25 = vld [vmem:[%s4385_s23 + $0x48] ss:$12 sps:$4 sm:$0xff]   ;;  %1694 = vmatprep.mubr.bf16.mxu0 %v4218_v28 }
 0x201   : > { %v4066_v24 = vld [vmem:[%s4385_s23 + $0x4c] ss:$12 sps:$4 sm:$0xff]   ;;  %v4069_v26 = vld [vmem:[%s4385_s23 + $0x50] ss:$12 sps:$4 sm:$0xff]   ;;  %v4070_v27 = vld [vmem:[%s4385_s23 + $0x34] ss:$12 sps:$4 sm:$0xff]   ;;  %3830 = vmatprep.mubr.msk.bf16.mxu1 %vm4219_vm0, %v4217_v5 }
 0x202   : > { %v1459_v2 = vld [vmem:[#allocation2 + $0x8] sm:$0xff]  ;;  %1665 = vmatpush1.bf16.msra.mxu0 %v4056_v16  ;;  %3817 = vmatpush3.bf16.msra.mxu1 %v4057_v17  ;;  %v4072_v29 = vld [vmem:[%s4385_s23 + $0x30] ss:$12 sps:$4 sm:$0xff]   ;;  %v4073_v30 = vld [vmem:[%s4385_s23 + $0x38] ss:$12 sps:$4 sm:$0xff]   ;;  %vm1754_vm1 = vcmask 261120  }
 0x203   : > { %1464 = vadd.xlane.f32.xlu0 %v1459_v2  ;;  %3818 = vmatprep.subr.bf16.mxu1 %v4217_v5  ;;  %v4074_v31 = vld [vmem:[%s4385_s23 + $0x1c] ss:$12 sps:$4 sm:$0xff]   ;;  %v4076_v32 = vld [vmem:[%s4385_s23 + $0x18] ss:$12 sps:$4 sm:$0xff]   ;;  %v4077_v33 = vld [vmem:[%s4385_s23 + $0x20] ss:$12 sps:$4 sm:$0xff]  }
 0x204   : > { %1666 = vmatprep.subr.bf16.mxu0 %v4058_v18  ;;  %v4078_v34 = vld [vmem:[%s4385_s23 + $0x4] ss:$12 sps:$4 sm:$0xff]   ;;  %v4080_v35 = vld [vmem:[%s4385_s23] ss:$12 sps:$4 sm:$0xff]   ;;  %v4081_v36 = vld [vmem:[%s4385_s23 + $0x8] ss:$12 sps:$4 sm:$0xff]   ;;  %s5042_s23 = scalar_lea.vmem %s4994_s13, %s4361_s27 }
 0x205   : > { %v3588_v45 = vld [vmem:[%s5040_s1] ss:$0 sm:$0xff]  ;;  %vm1875_vm2 = vcmask 1043456   ;;  %vm1847_vm3 = vcmask 64512   ;;  %s4220_s11 = smov 96   ;;  %s4221_s8 = smov 64  }
 0x206   : > { %1667 = vmatpush1.bf16.msra.mxu0 %v4060_v19  ;;  %3819 = vmatpush3.bf16.msra.mxu1 %v4061_v20  ;;  %v3589_v49 = vld [vmem:[%s5041_s7] ss:$0 sm:$0xff]  ;;  %s4222_s0 = smov 32   ;;  %vm2657_vm4 = vcmask 523264   ;;  %vm2660_vm5 = vcmask 785408   ;;  %s5044_s7 = scalar_lea.vmem %s4996_s15, %s4361_s27 }
 0x207   : > { %3820 = vmatprep.subr.bf16.mxu1 %v4217_v5  ;;  %1668 = vmatprep.subr.bf16.mxu0 %v4062_v21  ;;  %p3674_p5 = scmp.ne.s32.totalorder %s4355_s26, 1 }
 0x208   : > { %s5047_s6 = sld [smem:[#allocation16_spill]] (!%p3674_p5) }
 0x209   : > { %s5048_s1 = sld [smem:[#allocation17_spill]] (!%p3674_p5) }
 0x20a   : > { %1669 = vmatpush1.bf16.msra.mxu0 %v4064_v22  ;;  %3821 = vmatpush3.bf16.msra.mxu1 %v4065_v23  ;;  %s5049_s30 = sld [smem:[#allocation18_spill]] (!%p3674_p5) }
 0x20b   : > { %1670 = vmatprep.subr.bf16.mxu0 %v4066_v24  ;;  %3822 = vmatprep.subr.bf16.mxu1 %v4217_v5 }
 0x20e   : > { %1671 = vmatpush1.bf16.msra.mxu0 %v4068_v25  ;;  %3823 = vmatpush3.bf16.msra.mxu1 %v4069_v26 }
 0x20f   : > { %1672 = vmatprep.subr.bf16.mxu0 %v4070_v27  ;;  %3824 = vmatprep.subr.bf16.mxu1 %v4217_v5 }
 0x212   : > { %1673 = vmatpush1.bf16.msra.mxu0 %v4072_v29  ;;  %3825 = vmatpush3.bf16.msra.mxu1 %v4073_v30 }
 0x213   : > { %1674 = vmatprep.subr.bf16.mxu0 %v4074_v31  ;;  %3826 = vmatprep.subr.bf16.mxu1 %v4217_v5 }
 0x216   : > { %1675 = vmatpush1.bf16.msra.mxu0 %v4076_v32  ;;  %3827 = vmatpush3.bf16.msra.mxu1 %v4077_v33 }
 0x217   : > { %1676 = vmatprep.subr.bf16.mxu0 %v4078_v34  ;;  %3828 = vmatprep.subr.bf16.mxu1 %v4217_v5 }
 0x21a   : > { %1677 = vmatpush1.bf16.msra.mxu0 %v4080_v35  ;;  %3829 = vmatpush3.bf16.msra.mxu1 %v4081_v36 }
 0x21b   : > { %3834 = vmatprep.subr.bf16.mxu1 %v4217_v5  ;;  %3858 = vmatprep.subr.bf16.mxu0 %v4217_v5 }
 0x288   : > { %v1463_v7 = vpop.xlane.xlu0 %1462 }
 0x289   : > { %v1467_v8 = vmul.f32 0.0078125, %v1463_v7 }
 0x28b   : > { %v4590_v9 = vsub.f32 %v1458_v1, %v1467_v8 }
 0x28c   : > { %v1465_v10 = vpop.xlane.xlu0 %1464 }
 0x28d   : > { %v1468_v11 = vmul.f32 0.0078125, %v1465_v10  ;;  %v1471_v12 = vmul.f32 %v4590_v9, %v4590_v9 }
 0x28f   : > { %v4594_v13 = vsub.f32 %v1459_v2, %v1468_v11  ;;  %1473 = vadd.xlane.f32.xlu1 %v1471_v12 }
 0x291   : > { %v1472_v14 = vmul.f32 %v4594_v13, %v4594_v13 }
 0x293   : > { %1475 = vadd.xlane.f32.xlu1 %v1472_v14 }
 0x318   : > { %v1474_v37 = vpop.xlane.xlu1 %1473 }
 0x319   : > { %v1477_v38 = vmul.f32 0.0078125, %v1474_v37 }
 0x31b   : > { %v1479_v39 = vadd.f32 1e-05, %v1477_v38 }
 0x31c   : > { %v1476_v40 = vpop.xlane.xlu1 %1475 }
 0x31d   : > { %4130 = vrsqrt.f32 %v1479_v39  ;;  %v1478_v41 = vmul.f32 0.0078125, %v1476_v40 }
 0x31f   : > { %v1480_v42 = vadd.f32 1e-05, %v1478_v41 }
 0x321   : > { %4132 = vrsqrt.f32 %v1480_v42 }
 0x32a   : > { %v4131_v43 = vpop.eup %4130 }
 0x32b   : > { %v1483_v44 = vmul.f32 %v4131_v43, %v4590_v9 }
 0x32d   : > { %v1491_v48 = vmul.f32 %v3588_v45, %v1483_v44 }
 0x32e   : > { %v4133_v46 = vpop.eup %4132 }
 0x32f   : > { %v1484_v47 = vmul.f32 %v4133_v46, %v4594_v13  ;;  %v1499_v51 = vadd.f32 %v3589_v49, %v1491_v48 }
 0x331   : > { %v1492_v50 = vmul.f32 %v3588_v45, %v1484_v47 }
 0x333   : > { %v1500_v52 = vadd.f32 %v3589_v49, %v1492_v50 }
 0x335   : > { %v1501_v53 = vpack.c.bf16 %v1500_v52, %v1499_v51 }
 0x337   : > { %1695 = vmatmul.mubr.bf16.vlgmr.msra.gmra.mxu0 %v1501_v53  ;;  %3831 = vmatmul.mubr.bf16.vlgmr.msra.gmra.mxu1 %v1501_v53 }
 0x338   : > { %3836 = vmatprep.mubr.msk.bf16.mxu1 %vm4219_vm0, %v4217_v5  ;;  %3860 = vmatprep.mubr.msk.bf16.mxu0 %vm4219_vm0, %v4217_v5 }
 0x3f7   : > { %v1696_v54 = vpop.f32.mrf.mxu0  ;;  %v1739_v55 = vpop.f32.mrf.mxu1 }
 0x3f8   : > { %v1746_v0 = vmul.f32 0.17677669, %v1696_v54  ;;  %v4664_v6 = vpack.c.bf16 %v1739_v55, %v1739_v55 }
 0x3f9   : > { %v1698_v56 = vpop.f32.mrf.mxu0  ;;  %v3832_v57 = vpop.f32.mrf.mxu1 }
 0x3fa   : > { %v4646_v58 = vpack.c.bf16 %v1698_v56, %v1698_v56  ;;  %v4655_v2 = vpack.c.bf16 %v1746_v0, %v1746_v0  ;;  %v1877_v8 = vsel %vm1875_vm2, %v4664_v6, 0 }
 0x3fb   : > { %v1700_v59 = vpop.f32.mrf.mxu0  ;;  %v4648_v60 = vpop.f32.mrf.mxu1 }
 0x3fc   : > { %v1759_v61 = vsel %vm1754_vm1, %v4646_v58, 0  ;;  %v1747_v4 = vmul.f32 0.17677669, %v1700_v59  ;;  %v4694_v37 = vpack.c.bf16 %v4648_v60, %v4648_v60 }
 0x3fd   : > { %v1702_v62 = vpop.f32.mrf.mxu0  ;;  %v3833_v63 = vpop.f32.mrf.mxu1  ;;  %3835 = vmatpush3.bf16.xpose.msra.mxu1 %v1759_v61 }
 0x3fe   : > { %3840 = vmatprep.subr.bf16.mxu1 %v4217_v5  ;;  %v4653_v1 = vpack.c.bf16 %v1702_v62, %v1702_v62  ;;  %v4666_v7 = vpack.c.bf16 %v1747_v4, %v1747_v4  ;;  %v1923_v40 = vsel %vm1875_vm2, %v4694_v37, 0 }
 0x400   : > { %v1805_v3 = vsel %vm1754_vm1, %v4653_v1, 0 }
 0x404   : > { %3837 = vmatmul.mubr.msk.bf16.vlgmr.msra.gmra.mxu1 %vm1754_vm1, %v4655_v2 }
 0x405   : > { %3841 = vmatpush3.bf16.xpose.msra.mxu1 %v1805_v3  ;;  %3842 = vmatprep.mubr.msk.bf16.mxu1 %vm4219_vm0, %v4217_v5 }
 0x406   : > { %3846 = vmatprep.subr.bf16.mxu1 %v4217_v5 }
 0x40c   : > { %3843 = vmatmul.mubr.msk.bf16.vlgmr.msra.gmra.mxu1 %vm1754_vm1, %v4666_v7 }
 0x40d   : > { %3847 = vmatpush3.bf16.msra.mxu1 %v1877_v8  ;;  %3848 = vmatprep.mubr.msk.bf16.mxu1 %vm4219_vm0, %v4217_v5 }
 0x40e   : > { %3852 = vmatprep.subr.bf16.mxu1 %v4217_v5 }
 0x4c4   : > { %v1795_v9 = vpop.f32.mrf.mxu1 }
 0x4c5   : > { %v1848_v10 = vsel %vm1847_vm3, %v1795_v9, -inf }
 0x4c6   : > { %1849 = vmax.xlane.f32.xlu0 %v1848_v10  ;;  %v3838_v11 = vpop.f32.mrf.mxu1 }
 0x4c8   : > { %v1798_v12 = vpop.f32.mrf.mxu1 }
 0x4ca   : > { %v3839_v13 = vpop.f32.mrf.mxu1 }
 0x4cc   : > { %v1841_v14 = vpop.f32.mrf.mxu1 }
 0x4cd   : > { %v1851_v15 = vsel %vm1847_vm3, %v1841_v14, -inf }
 0x4ce   : > { %1852 = vmax.xlane.f32.xlu1 %v1851_v15  ;;  %v3844_v16 = vpop.f32.mrf.mxu1 }
 0x4d0   : > { %v1844_v17 = vpop.f32.mrf.mxu1 }
 0x4d2   : > { %v3845_v18 = vpop.f32.mrf.mxu1 }
 0x4df   : > { %2021 = vrot.lane.b32.xlu1 %v4653_v1, %s4220_s11 }
 0x54f   : > { %v1850_v19 = vpop.xlane.xlu0 %1849 }
 0x550   : > { %v1854_v20 = vsub.f32 %v1795_v9, %v1850_v19 }
 0x552   : > { %v1856_v21 = vmul.f32 1.442695, %v1854_v20 }
 0x554   : > { %4134 = vpow2.f32 %v1856_v21 }
 0x557   : > { %v1853_v22 = vpop.xlane.xlu1 %1852 }
 0x558   : > { %v1855_v23 = vsub.f32 %v1841_v14, %v1853_v22 }
 0x55a   : > { %v1858_v24 = vmul.f32 1.442695, %v1855_v23 }
 0x55b   : > { %v2022_v31 = vpop.permute.xlu1 %2021 }
 0x55c   : > { %4136 = vpow2.f32 %v1858_v24  ;;  %v2027_v44 = vsel %vm1754_vm1, %v2022_v31, 0 }
 0x561   : > { %v4135_v25 = vpop.eup %4134 }
 0x562   : > { %v1860_v26 = vsel %vm1847_vm3, %v4135_v25, 0.0 }
 0x563   : > { %1861 = vadd.xlane.f32.xlu0 %v1860_v26 }
 0x569   : > { %v4137_v27 = vpop.eup %4136 }
 0x56a   : > { %v1863_v29 = vsel %vm1847_vm3, %v4137_v27, 0.0 }
 0x56b   : > { %1864 = vadd.xlane.f32.xlu1 %v1863_v29 }
 0x579   : > { %1969 = vrot.lane.b32.xlu0 %v4646_v58, %s4220_s11 }
 0x57c   : > { %1966 = vrot.lane.b32.xlu1 %v4655_v2, %s4220_s11 }
 0x580   : > { %2018 = vrot.lane.b32.xlu1 %v4666_v7, %s4220_s11 }
 0x5ec   : > { %v1862_v30 = vpop.xlane.xlu0 %1861 }
 0x5ed   : > { %4138 = vrcp.f32 %v1862_v30 }
 0x5f0   : > { %v1970_v32 = vpop.permute.xlu0 %1969 }
 0x5f1   : > { %v1975_v33 = vsel %vm1754_vm1, %v1970_v32, 0 }
 0x5f2   : > { %3859 = vmatpush3.bf16.xpose.msra.mxu0 %v1975_v33 }
 0x5f3   : > { %3870 = vmatprep.subr.bf16.mxu0 %v4217_v5 }
 0x5f4   : > { %v1865_v34 = vpop.xlane.xlu1 %1864 }
 0x5f5   : > { %4140 = vrcp.f32 %v1865_v34 }
 0x5f8   : > { %v1967_v35 = vpop.permute.xlu1 %1966 }
 0x5f9   : > { %3861 = vmatmul.mubr.msk.bf16.vlgmr.msra.gmra.mxu0 %vm1754_vm1, %v1967_v35 }
 0x5fa   : > { %v4139_v36 = vpop.eup %4138  ;;  %3872 = vmatprep.mubr.msk.bf16.mxu0 %vm4219_vm0, %v4217_v5 }
 0x5fb   : > { %v1868_v38 = vmul.f32 %v4139_v36, %v4135_v25 }
 0x5fc   : > { %v2019_v45 = vpop.permute.xlu1 %2018 }
 0x5fd   : > { %v1870_v39 = vpack.c.bf16 %v1868_v38, %v1868_v38 }
 0x5ff   : > { %3849 = vmatmul.mubr.msk.bf16.vlgmr.msra.gmra.mxu1 %vm1847_vm3, %v1870_v39 }
 0x600   : > { %3853 = vmatpush3.bf16.msra.mxu1 %v1923_v40  ;;  %3854 = vmatprep.mubr.msk.bf16.mxu1 %vm4219_vm0, %v4217_v5 }
 0x601   : > { %3864 = vmatprep.subr.bf16.mxu1 %v4217_v5 }
 0x602   : > { %v4141_v41 = vpop.eup %4140 }
 0x603   : > { %v1869_v42 = vmul.f32 %v4141_v41, %v4137_v27 }
 0x605   : > { %v1871_v43 = vpack.c.bf16 %v1869_v42, %v1869_v42 }
 0x607   : > { %3855 = vmatmul.mubr.msk.bf16.vlgmr.msra.gmra.mxu1 %vm1847_vm3, %v1871_v43 }
 0x608   : > { %3865 = vmatpush3.bf16.xpose.msra.mxu1 %v2027_v44  ;;  %3866 = vmatprep.mubr.msk.bf16.mxu1 %vm4219_vm0, %v4217_v5 }
 0x609   : > { %3876 = vmatprep.subr.bf16.mxu1 %v4217_v5 }
 0x60f   : > { %3867 = vmatmul.mubr.msk.bf16.vlgmr.msra.gmra.mxu1 %vm1754_vm1, %v2019_v45 }
 0x610   : > { %3878 = vmatprep.mubr.msk.bf16.mxu1 %vm4219_vm0, %v4217_v5 }
 0x6b9   : > { %v2011_v46 = vpop.f32.mrf.mxu0 }
 0x6ba   : > { %v2069_v47 = vsel %vm1847_vm3, %v2011_v46, -inf }
 0x6bb   : > { %2070 = vmax.xlane.f32.xlu0 %v2069_v47  ;;  %v3862_v48 = vpop.f32.mrf.mxu0 }
 0x6bd   : > { %v2014_v49 = vpop.f32.mrf.mxu0 }
 0x6bf   : > { %v4711_v50 = vpop.f32.mrf.mxu1  ;;  %v3863_v51 = vpop.f32.mrf.mxu0 }
 0x6c1   : > { %v3850_v52 = vpop.f32.mrf.mxu1 }
 0x6c3   : > { %v1916_v53 = vpop.f32.mrf.mxu1 }
 0x6c5   : > { %v3851_v54 = vpop.f32.mrf.mxu1 }
 0x6c7   : > { %v4713_v55 = vpop.f32.mrf.mxu1 }
 0x6c9   : > { %v3856_v56 = vpop.f32.mrf.mxu1 }
 0x6cb   : > { %v1962_v57 = vpop.f32.mrf.mxu1 }
 0x6cd   : > { %v3857_v59 = vpop.f32.mrf.mxu1 }
 0x6cf   : > { %v2063_v60 = vpop.f32.mrf.mxu1 }
 0x6d0   : > { %v2072_v61 = vsel %vm1847_vm3, %v2063_v60, -inf }
 0x6d1   : > { %2073 = vmax.xlane.f32.xlu1 %v2072_v61  ;;  %v3868_v62 = vpop.f32.mrf.mxu1 }
 0x6d3   : > { %v2066_v63 = vpop.f32.mrf.mxu1 }
 0x6d5   : > { %v3869_v0 = vpop.f32.mrf.mxu1 }
 0x6e2   : > { %2143 = vrot.lane.b32.xlu1 %v4694_v37, %s4220_s11 }
 0x6e6   : > { %2193 = vrot.lane.b32.xlu1 %v4646_v58, %s4221_s8 }
 0x6ea   : > { %2243 = vrot.lane.b32.xlu1 %v4653_v1, %s4221_s8 }
 0x6ee   : > { %2241 = vrot.lane.b32.xlu1 %v4666_v7, %s4221_s8 }
 0x744   : > { %v2071_v3 = vpop.xlane.xlu0 %2070 }
 0x745   : > { %v2075_v4 = vsub.f32 %v2011_v46, %v2071_v3 }
 0x747   : > { %v2077_v8 = vmul.f32 1.442695, %v2075_v4 }
 0x749   : > { %4142 = vpow2.f32 %v2077_v8 }
 0x756   : > { %v4143_v9 = vpop.eup %4142 }
 0x757   : > { %v2081_v10 = vsel %vm1847_vm3, %v4143_v9, 0.0 }
 0x758   : > { %2082 = vadd.xlane.f32.xlu0 %v2081_v10 }
 0x75a   : > { %v2074_v11 = vpop.xlane.xlu1 %2073 }
 0x75b   : > { %v2076_v12 = vsub.f32 %v2063_v60, %v2074_v11 }
 0x75d   : > { %v2079_v13 = vmul.f32 1.442695, %v2076_v12 }
 0x75e   : > { %v2144_v14 = vpop.permute.xlu1 %2143 }
 0x75f   : > { %4144 = vpow2.f32 %v2079_v13  ;;  %v2149_v15 = vsel %vm1875_vm2, %v2144_v14, 0 }
 0x760   : > { %3877 = vmatpush3.bf16.msra.mxu1 %v2149_v15 }
 0x761   : > { %3888 = vmatprep.subr.bf16.mxu1 %v4217_v5 }
 0x762   : > { %v2194_v24 = vpop.permute.xlu1 %2193 }
 0x763   : > { %v2199_v26 = vsel %vm1754_vm1, %v2194_v24, 0 }
 0x766   : > { %v2244_v30 = vpop.permute.xlu1 %2243 }
 0x767   : > { %v2249_v33 = vsel %vm1754_vm1, %v2244_v30, 0 }
 0x76a   : > { %v2242_v34 = vpop.permute.xlu1 %2241 }
 0x76c   : > { %v4145_v16 = vpop.eup %4144 }
 0x76d   : > { %v2084_v17 = vsel %vm1847_vm3, %v4145_v16, 0.0 }
 0x76e   : > { %2085 = vadd.xlane.f32.xlu0 %v2084_v17 }
 0x784   : > { %2094 = vrot.lane.b32.xlu0 %v4664_v6, %s4220_s11 }
 0x788   : > { %2191 = vrot.lane.b32.xlu0 %v4655_v2, %s4221_s8 }
 0x7e1   : > { %v2083_v18 = vpop.xlane.xlu0 %2082 }
 0x7e2   : > { %4146 = vrcp.f32 %v2083_v18 }
 0x7ef   : > { %v4147_v19 = vpop.eup %4146 }
 0x7f0   : > { %v2089_v21 = vmul.f32 %v4147_v19, %v4143_v9 }
 0x7f2   : > { %v2091_v25 = vpack.c.bf16 %v2089_v21, %v2089_v21 }
 0x7f7   : > { %v2086_v20 = vpop.xlane.xlu0 %2085 }
 0x7f8   : > { %4148 = vrcp.f32 %v2086_v20 }
 0x7fb   : > { %v2095_v22 = vpop.permute.xlu0 %2094 }
 0x7fc   : > { %v2100_v23 = vsel %vm1875_vm2, %v2095_v22, 0 }
 0x7fd   : > { %3871 = vmatpush3.bf16.msra.mxu0 %v2100_v23 }
 0x7fe   : > { %3882 = vmatprep.subr.bf16.mxu0 %v4217_v5 }
 0x7ff   : > { %v2192_v31 = vpop.permute.xlu0 %2191 }
 0x800   : > { %3873 = vmatmul.mubr.msk.bf16.vlgmr.msra.gmra.mxu0 %vm1847_vm3, %v2091_v25 }
 0x801   : > { %3883 = vmatpush3.bf16.xpose.msra.mxu0 %v2199_v26  ;;  %3884 = vmatprep.mubr.msk.bf16.mxu0 %vm4219_vm0, %v4217_v5 }
 0x802   : > { %3894 = vmatprep.subr.bf16.mxu0 %v4217_v5 }
 0x805   : > { %v4149_v27 = vpop.eup %4148 }
 0x806   : > { %v2090_v29 = vmul.f32 %v4149_v27, %v4145_v16 }
 0x808   : > { %3885 = vmatmul.mubr.msk.bf16.vlgmr.msra.gmra.mxu0 %vm1754_vm1, %v2192_v31  ;;  %v2092_v32 = vpack.c.bf16 %v2090_v29, %v2090_v29 }
 0x809   : > { %3896 = vmatprep.mubr.msk.bf16.mxu0 %vm4219_vm0, %v4217_v5 }
 0x80a   : > { %3879 = vmatmul.mubr.msk.bf16.vlgmr.msra.gmra.mxu1 %vm1847_vm3, %v2092_v32 }
 0x80b   : > { %3889 = vmatpush3.bf16.xpose.msra.mxu1 %v2249_v33  ;;  %3890 = vmatprep.mubr.msk.bf16.mxu1 %vm4219_vm0, %v4217_v5 }
 0x80c   : > { %3900 = vmatprep.subr.bf16.mxu1 %v4217_v5 }
 0x812   : > { %3891 = vmatmul.mubr.msk.bf16.vlgmr.msra.gmra.mxu1 %vm1754_vm1, %v2242_v34 }
 0x813   : > { %3902 = vmatprep.mubr.msk.bf16.mxu1 %vm4219_vm0, %v4217_v5 }
 0x8c0   : > { %v4750_v35 = vpop.f32.mrf.mxu0 }
 0x8c2   : > { %v3874_v36 = vpop.f32.mrf.mxu0 }
 0x8c4   : > { %v2139_v38 = vpop.f32.mrf.mxu0 }
 0x8c6   : > { %v3875_v39 = vpop.f32.mrf.mxu0 }
 0x8c8   : > { %v2235_v40 = vpop.f32.mrf.mxu0 }
 0x8c9   : > { %v2291_v41 = vsel %vm1847_vm3, %v2235_v40, -inf }
 0x8ca   : > { %2292 = vmax.xlane.f32.xlu0 %v2291_v41  ;;  %v4753_v42 = vpop.f32.mrf.mxu1  ;;  %v3886_v43 = vpop.f32.mrf.mxu0 }
 0x8cb   : > { %v4035_v44 = vpack.i.bf16 %v4753_v42, %v4750_v35 }
 0x8cc   : > { %v3880_v45 = vpop.f32.mrf.mxu1  ;;  %v2238_v46 = vpop.f32.mrf.mxu0 }
 0x8ce   : > { %v2188_v47 = vpop.f32.mrf.mxu1  ;;  %v3887_v48 = vpop.f32.mrf.mxu0 }
 0x8d0   : > { %v3881_v49 = vpop.f32.mrf.mxu1 }
 0x8d2   : > { %v2285_v51 = vpop.f32.mrf.mxu1 }
 0x8d3   : > { %v2294_v52 = vsel %vm1847_vm3, %v2285_v51, -inf }
 0x8d4   : > { %2295 = vmax.xlane.f32.xlu1 %v2294_v52  ;;  %v3892_v53 = vpop.f32.mrf.mxu1 }
 0x8d6   : > { %v2288_v54 = vpop.f32.mrf.mxu1 }
 0x8d8   : > { %v3893_v56 = vpop.f32.mrf.mxu1 }
 0x8e5   : > { %2363 = vrot.lane.b32.xlu1 %v4694_v37, %s4221_s8 }
 0x8e9   : > { %2413 = vrot.lane.b32.xlu1 %v4646_v58, %s4222_s0 }
 0x8ed   : > { %2463 = vrot.lane.b32.xlu1 %v4653_v1, %s4222_s0 }
 0x8f1   : > { %2461 = vrot.lane.b32.xlu1 %v4666_v7, %s4222_s0 }
 0x953   : > { %v2293_v57 = vpop.xlane.xlu0 %2292 }
 0x954   : > { %v2297_v59 = vsub.f32 %v2235_v40, %v2293_v57 }
 0x956   : > { %v2299_v60 = vmul.f32 1.442695, %v2297_v59 }
 0x958   : > { %4150 = vpow2.f32 %v2299_v60 }
 0x95d   : > { %v2296_v61 = vpop.xlane.xlu1 %2295 }
 0x95e   : > { %v2298_v62 = vsub.f32 %v2285_v51, %v2296_v61 }
 0x960   : > { %v2301_v63 = vmul.f32 1.442695, %v2298_v62 }
 0x961   : > { %v2364_v0 = vpop.permute.xlu1 %2363 }
 0x962   : > { %4152 = vpow2.f32 %v2301_v63  ;;  %v2369_v3 = vsel %vm1875_vm2, %v2364_v0, 0 }
 0x963   : > { %3901 = vmatpush3.bf16.msra.mxu1 %v2369_v3 }
 0x964   : > { %3912 = vmatprep.subr.bf16.mxu1 %v4217_v5 }
 0x965   : > { %v4151_v58 = vpop.eup %4150  ;;  %v2414_v14 = vpop.permute.xlu1 %2413 }
 0x966   : > { %v2303_v1 = vsel %vm1847_vm3, %v4151_v58, 0.0  ;;  %v2419_v16 = vsel %vm1754_vm1, %v2414_v14, 0 }
 0x967   : > { %2304 = vadd.xlane.f32.xlu0 %v2303_v1  ;;  %v4082_v1 = vld [vmem:[%s4376_s4 + $0x38] sm:$0xff]  }
 0x969   : > { %v2464_v18 = vpop.permute.xlu1 %2463 }
 0x96a   : > { %v2469_v21 = vsel %vm1754_vm1, %v2464_v18, 0 }
 0x96d   : > { %v2462_v22 = vpop.permute.xlu1 %2461 }
 0x96f   : > { %v4153_v4 = vpop.eup %4152 }
 0x970   : > { %v2306_v7 = vsel %vm1847_vm3, %v4153_v4, 0.0 }
 0x971   : > { %2307 = vadd.xlane.f32.xlu0 %v2306_v7  ;;  %v4084_v7 = vld [vmem:[%s4376_s4 + $0x28] sm:$0xff]  }
 0x987   : > { %2315 = vrot.lane.b32.xlu0 %v4664_v6, %s4221_s8 }
 0x98b   : > { %2411 = vrot.lane.b32.xlu0 %v4655_v2, %s4222_s0 }
 0x9f0   : > { %v2305_v8 = vpop.xlane.xlu0 %2304 }
 0x9f1   : > { %4154 = vrcp.f32 %v2305_v8  ;;  %v4085_v8 = vld [vmem:[%s4376_s4 + $0x20] sm:$0xff]  }
 0x9fa   : > { %v2308_v9 = vpop.xlane.xlu0 %2307 }
 0x9fb   : > { %4156 = vrcp.f32 %v2308_v9  ;;  %v4086_v9 = vld [vmem:[%s4376_s4 + $0x18] sm:$0xff]  }
 0x9fe   : > { %v4155_v10 = vpop.eup %4154  ;;  %v2316_v11 = vpop.permute.xlu0 %2315 }
 0x9ff   : > { %v2321_v12 = vsel %vm1875_vm2, %v2316_v11, 0  ;;  %v2311_v13 = vmul.f32 %v4155_v10, %v4151_v58  ;;  %v4088_v10 = vld [vmem:[%s4376_s4 + $0x8] sm:$0xff]  }
 0xa00   : > { %3895 = vmatpush3.bf16.msra.mxu0 %v2321_v12  ;;  %v4089_v12 = vld [vmem:[%s4376_s4] sm:$0xff]  }
 0xa01   : > { %v2313_v15 = vpack.c.bf16 %v2311_v13, %v2311_v13  ;;  %3906 = vmatprep.subr.bf16.mxu0 %v4217_v5 }
 0xa02   : > { %v2412_v19 = vpop.permute.xlu0 %2411 }
 0xa03   : > { %3897 = vmatmul.mubr.msk.bf16.vlgmr.msra.gmra.mxu0 %vm1847_vm3, %v2313_v15 }
 0xa04   : > { %3907 = vmatpush3.bf16.xpose.msra.mxu0 %v2419_v16  ;;  %3908 = vmatprep.mubr.msk.bf16.mxu0 %vm4219_vm0, %v4217_v5 }
 0xa05   : > { %3918 = vmatprep.subr.bf16.mxu0 %v4217_v5 }
 0xa08   : > { %v4157_v2 = vpop.eup %4156 }
 0xa09   : > { %v2312_v17 = vmul.f32 %v4157_v2, %v4153_v4  ;;  %v4083_v4 = vld [vmem:[%s4376_s4 + $0x30] sm:$0xff]  }
 0xa0b   : > { %3909 = vmatmul.mubr.msk.bf16.vlgmr.msra.gmra.mxu0 %vm1754_vm1, %v2412_v19  ;;  %v2314_v20 = vpack.c.bf16 %v2312_v17, %v2312_v17 }
 0xa0c   : > { %3920 = vmatprep.mubr.msk.bf16.mxu0 %vm4219_vm0, %v4217_v5 }
 0xa0d   : > { %3903 = vmatmul.mubr.msk.bf16.vlgmr.msra.gmra.mxu1 %vm1847_vm3, %v2314_v20 }
 0xa0e   : > { %3913 = vmatpush3.bf16.xpose.msra.mxu1 %v2469_v21  ;;  %3914 = vmatprep.mubr.msk.bf16.mxu1 %vm4219_vm0, %v4217_v5 }
 0xa0f   : > { %3924 = vmatprep.subr.bf16.mxu1 %v4217_v5 }
 0xa15   : > { %3915 = vmatmul.mubr.msk.bf16.vlgmr.msra.gmra.mxu1 %vm1754_vm1, %v2462_v22 }
 0xa16   : > { %3926 = vmatprep.mubr.msk.bf16.mxu1 %vm4219_vm0, %v4217_v5 }
 0xac3   : > { %v2357_v23 = vpop.f32.mrf.mxu0 }
 0xac5   : > { %v3898_v24 = vpop.f32.mrf.mxu0 }
 0xac7   : > { %v2360_v25 = vpop.f32.mrf.mxu0 }
 0xac9   : > { %v3899_v26 = vpop.f32.mrf.mxu0 }
 0xacb   : > { %v2455_v27 = vpop.f32.mrf.mxu0 }
 0xacc   : > { %v2511_v29 = vsel %vm1847_vm3, %v2455_v27, -inf }
 0xacd   : > { %2512 = vmax.xlane.f32.xlu0 %v2511_v29  ;;  %v2405_v30 = vpop.f32.mrf.mxu1  ;;  %v3910_v31 = vpop.f32.mrf.mxu0 }
 0xace   : > { %v4040_v46 = vpack.i.bf16 %v2405_v30, %v2357_v23 }
 0xacf   : > { %v3904_v32 = vpop.f32.mrf.mxu1  ;;  %v2458_v33 = vpop.f32.mrf.mxu0 }
 0xad1   : > { %v2408_v34 = vpop.f32.mrf.mxu1  ;;  %v3911_v36 = vpop.f32.mrf.mxu0 }
 0xad3   : > { %v3905_v38 = vpop.f32.mrf.mxu1 }
 0xad5   : > { %v2505_v39 = vpop.f32.mrf.mxu1 }
 0xad6   : > { %v2514_v40 = vsel %vm1847_vm3, %v2505_v39, -inf }
 0xad7   : > { %2515 = vmax.xlane.f32.xlu1 %v2514_v40  ;;  %v3916_v41 = vpop.f32.mrf.mxu1 }
 0xad9   : > { %v2508_v43 = vpop.f32.mrf.mxu1 }
 0xadb   : > { %v3917_v45 = vpop.f32.mrf.mxu1 }
 0xadc   : > { %v4179_v45 = vld [vmem:[#allocation2 + $0x8] sm:$0xff] }
 0xae8   : > { %2583 = vrot.lane.b32.xlu1 %v4694_v37, %s4222_s0 }
 0xaec   : > { %4036 = vrot.lane.b32.xlu1 %v4035_v44, %s4222_s0 }
 0xaf0   : > { %4041 = vrot.lane.b32.xlu1 %v4040_v46, %s4221_s8 }
 0xb56   : > { %v2513_v47 = vpop.xlane.xlu0 %2512 }
 0xb57   : > { %v2517_v48 = vsub.f32 %v2455_v27, %v2513_v47 }
 0xb59   : > { %v2519_v49 = vmul.f32 1.442695, %v2517_v48 }
 0xb5b   : > { %4158 = vpow2.f32 %v2519_v49  ;;  %v4090_v49 = vld [vmem:[%s4399_s12 + $0x70] ss:$8 sps:$4 sm:$0xff]  }
 0xb60   : > { %v2516_v51 = vpop.xlane.xlu1 %2515 }
 0xb61   : > { %v2518_v52 = vsub.f32 %v2505_v39, %v2516_v51  ;;  %v3638_v39 = vld [vmem:[%s5042_s23] ss:$0 sm:$0xff]  ;;  %v4092_v51 = vld [vmem:[%s4399_s12 + $0x74] ss:$8 sps:$4 sm:$0xff]  }
 0xb63   : > { %v2521_v53 = vmul.f32 1.442695, %v2518_v52 }
 0xb64   : > { %v2584_v54 = vpop.permute.xlu1 %2583 }
 0xb65   : > { %4160 = vpow2.f32 %v2521_v53  ;;  %v2589_v56 = vsel %vm1875_vm2, %v2584_v54, 0 }
 0xb66   : > { %3925 = vmatpush3.bf16.msra.mxu1 %v2589_v56 }
 0xb67   : > { %2929 = vmatprep.subr.bf16.mxu1 %v4092_v51 }
 0xb68   : > { %v4159_v37 = vpop.eup %4158  ;;  %v4037_v20 = vpop.permute.xlu1 %4036 }
 0xb69   : > { %v2523_v57 = vsel %vm1847_vm3, %v4159_v37, 0.0  ;;  %v4039_v22 = vunpack.i.h.bf16 %v4037_v20  ;;  %v4038_v23 = vunpack.i.l.bf16 %v4037_v20 }
 0xb6a   : > { %2524 = vadd.xlane.f32.xlu0 %v2523_v57 }
 0xb6b   : > { %v2656_v26 = vsel %vm1754_vm1, %v4713_v55, %v4039_v22  ;;  %v2655_v27 = vsel %vm1754_vm1, %v4711_v50, %v4038_v23  ;;  %v4178_v55 = vld [vmem:[#allocation2] sm:$0xff] }
 0xb6c   : > { %v4042_v21 = vpop.permute.xlu1 %4041 }
 0xb6d   : > { %v4044_v24 = vunpack.i.h.bf16 %v4042_v21 }
 0xb6f   : > { %v2659_v32 = vsel %vm2657_vm4, %v2656_v26, %v4044_v24  ;;  %v4114_v24 = vld [vmem:[%s4410_s21 + $0x78] sm:$0xff]   ;;  %v4117_v26 = vld [vmem:[%s4410_s21 + $0x30] sm:$0xff]  }
 0xb72   : > { %v4161_v35 = vpop.eup %4160 }
 0xb73   : > { %v2526_v42 = vsel %vm1847_vm3, %v4161_v35, 0.0 }
 0xb74   : > { %2527 = vadd.xlane.f32.xlu0 %v2526_v42 }
 0xb8a   : > { %2535 = vrot.lane.b32.xlu0 %v4664_v6, %s4222_s0 }
 0xbf3   : > { %v2525_v44 = vpop.xlane.xlu0 %2524 }
 0xbf4   : > { %4162 = vrcp.f32 %v2525_v44  ;;  %v4095_v44 = vld [vmem:[%s4399_s12 + $0x64] ss:$8 sps:$4 sm:$0xff]  }
 0xbfd   : > { %v2528_v59 = vpop.xlane.xlu0 %2527 }
 0xbfe   : > { %4164 = vrcp.f32 %v2528_v59  ;;  %v4093_v59 = vld [vmem:[%s4399_s12 + $0x60] ss:$8 sps:$4 sm:$0xff]  }
 0xc01   : > { %v4163_v60 = vpop.eup %4162  ;;  %v2536_v61 = vpop.permute.xlu0 %2535 }
 0xc02   : > { %v2541_v62 = vsel %vm1875_vm2, %v2536_v61, 0  ;;  %v2531_v63 = vmul.f32 %v4163_v60, %v4159_v37  ;;  %v4098_v60 = vld [vmem:[%s4399_s12 + $0x54] ss:$8 sps:$4 sm:$0xff]   ;;  %v4096_v61 = vld [vmem:[%s4399_s12 + $0x50] ss:$8 sps:$4 sm:$0xff]  }
 0xc03   : > { %3919 = vmatpush3.bf16.msra.mxu0 %v2541_v62  ;;  %v4099_v62 = vld [vmem:[%s4399_s12 + $0x40] ss:$8 sps:$4 sm:$0xff]  }
 0xc04   : > { %v2533_v0 = vpack.c.bf16 %v2531_v63, %v2531_v63  ;;  %3930 = vmatprep.subr.bf16.mxu0 %v4217_v5  ;;  %v4101_v63 = vld [vmem:[%s4399_s12 + $0x44] ss:$8 sps:$4 sm:$0xff]  }
 0xc06   : > { %3921 = vmatmul.mubr.msk.bf16.vlgmr.msra.gmra.mxu0 %vm1847_vm3, %v2533_v0  ;;  %v4104_v0 = vld [vmem:[%s4399_s12 + $0x34] ss:$8 sps:$4 sm:$0xff]  }
 0xc07   : > { %3946 = vmatprep.mubr.msk.bf16.mxu0 %vm4219_vm0, %v4217_v5  ;;  %3931 = vmatpush3.bf16.msra.mxu0 %v4082_v1  ;;  %v4110_v1 = vld [vmem:[%s4399_s12 + $0x14] ss:$8 sps:$4 sm:$0xff]  }
 0xc08   : > { %3932 = vmatprep.subr.bf16.mxu0 %v4217_v5 }
 0xc0b   : > { %v4165_v6 = vpop.eup %4164  ;;  %3933 = vmatpush3.bf16.msra.mxu0 %v4083_v4  ;;  %v4108_v4 = vld [vmem:[%s4399_s12 + $0x10] ss:$8 sps:$4 sm:$0xff]  }
 0xc0c   : > { %v2532_v3 = vmul.f32 %v4165_v6, %v4161_v35  ;;  %3934 = vmatprep.subr.bf16.mxu0 %v4217_v5  ;;  %v4102_v6 = vld [vmem:[%s4399_s12 + $0x30] ss:$8 sps:$4 sm:$0xff]  }
 0xc0e   : > { %v2534_v58 = vpack.c.bf16 %v2532_v3, %v2532_v3  ;;  %v4107_v3 = vld [vmem:[%s4399_s12 + $0x24] ss:$8 sps:$4 sm:$0xff]  }
 0xc0f   : > { %3935 = vmatpush3.bf16.msra.mxu0 %v4084_v7  ;;  %v4113_v7 = vld [vmem:[%s4399_s12 + $0x4] ss:$8 sps:$4 sm:$0xff]  }
 0xc10   : > { %3927 = vmatmul.mubr.msk.bf16.vlgmr.msra.gmra.mxu1 %vm1847_vm3, %v2534_v58  ;;  %3936 = vmatprep.subr.bf16.mxu0 %v4217_v5  ;;  %v4105_v58 = vld [vmem:[%s4399_s12 + $0x20] ss:$8 sps:$4 sm:$0xff]  }
 0xc11   : > { %2961 = vmatprep.mubr.bf16.mxu1 %v4218_v28  ;;  %v4087_v28 = vld [vmem:[%s4376_s4 + $0x10] sm:$0xff]   ;;  %2930 = vmatpush1.bf16.msra.mxu1 %v4090_v49 }
 0xc12   : > { %2931 = vmatprep.subr.bf16.mxu1 %v4095_v44 }
 0xc13   : > { %3937 = vmatpush3.bf16.msra.mxu0 %v4085_v8  ;;  %v4111_v8 = vld [vmem:[%s4399_s12] ss:$8 sps:$4 sm:$0xff]   ;;  %s5043_s12 = scalar_lea.vmem %s4995_s14, %s4361_s27 }
 0xc14   : > { %3938 = vmatprep.subr.bf16.mxu0 %v4217_v5 }
 0xc15   : > { %2932 = vmatpush1.bf16.msra.mxu1 %v4093_v59 }
 0xc16   : > { %2933 = vmatprep.subr.bf16.mxu1 %v4098_v60 }
 0xc17   : > { %3939 = vmatpush3.bf16.msra.mxu0 %v4086_v9 }
 0xc18   : > { %3940 = vmatprep.subr.bf16.mxu0 %v4217_v5 }
 0xc19   : > { %2934 = vmatpush1.bf16.msra.mxu1 %v4096_v61 }
 0xc1a   : > { %2935 = vmatprep.subr.bf16.mxu1 %v4101_v63 }
 0xc1b   : > { %3941 = vmatpush3.bf16.msra.mxu0 %v4087_v28 }
 0xc1c   : > { %3942 = vmatprep.subr.bf16.mxu0 %v4217_v5 }
 0xc1d   : > { %2936 = vmatpush1.bf16.msra.mxu1 %v4099_v62 }
 0xc1e   : > { %2937 = vmatprep.subr.bf16.mxu1 %v4104_v0 }
 0xc1f   : > { %3943 = vmatpush3.bf16.msra.mxu0 %v4088_v10 }
 0xc20   : > { %3944 = vmatprep.subr.bf16.mxu0 %v4217_v5  ;;  %v4043_v5 = vunpack.i.l.bf16 %v4042_v21 }
 0xc21   : > { %2938 = vmatpush1.bf16.msra.mxu1 %v4102_v6 }
 0xc22   : > { %v2658_v31 = vsel %vm2657_vm4, %v2655_v27, %v4043_v5  ;;  %2939 = vmatprep.subr.bf16.mxu1 %v4107_v3  ;;  %v4115_v5 = vld [vmem:[%s4410_s21 + $0x38] sm:$0xff]   ;;  %v4118_v27 = vld [vmem:[%s4410_s21 + $0x68] sm:$0xff]  }
 0xc23   : > { %3945 = vmatpush3.bf16.msra.mxu0 %v4089_v12 }
 0xc24   : > { %3792 = vmatprep.subr.bf16.mxu0 %v4114_v24 }
 0xc25   : > { %2940 = vmatpush1.bf16.msra.mxu1 %v4105_v58 }
 0xc26   : > { %2941 = vmatprep.subr.bf16.mxu1 %v4110_v1 }
 0xc29   : > { %2942 = vmatpush1.bf16.msra.mxu1 %v4108_v4 }
 0xc2a   : > { %2943 = vmatprep.subr.bf16.mxu1 %v4113_v7 }
 0xc2d   : > { %2944 = vmatpush1.bf16.msra.mxu1 %v4111_v8 }
 0xcc6   : > { %v2577_v11 = vpop.f32.mrf.mxu0 }
 0xcc8   : > { %v3922_v13 = vpop.f32.mrf.mxu0 }
 0xcca   : > { %v2580_v14 = vpop.f32.mrf.mxu0 }
 0xccc   : > { %v3923_v15 = vpop.f32.mrf.mxu0 }
 0xcd0   : > { %v2625_v16 = vpop.f32.mrf.mxu1 }
 0xcd1   : > { %v4045_v2 = vpack.i.bf16 %v2625_v16, %v2577_v11  ;;  %v3639_v16 = vld [vmem:[%s5043_s12] ss:$0 sm:$0xff] }
 0xcd2   : > { %v3928_v17 = vpop.f32.mrf.mxu1 }
 0xcd3   : > { %4046 = vrot.lane.b32.xlu0 %v4045_v2, %s4220_s11  ;;  %s5045_s11 = scalar_lea.vmem %s5000_s19, %s4361_s27  ;;  %s5046_s27 = sld [smem:[#allocation15_spill]] (!%p3674_p5) }
 0xcd4   : > { %v2628_v18 = vpop.f32.mrf.mxu1 }
 0xcd6   : > { %v3929_v19 = vpop.f32.mrf.mxu1 }
 0xcd7   : > { %v3640_v19 = vld [vmem:[%s5044_s7] ss:$0 sm:$0xff] }
 0xd45   : > { %v4047_v25 = vpop.permute.xlu0 %4046 }
 0xd46   : > { %v4049_v29 = vunpack.i.h.bf16 %v4047_v25  ;;  %v4048_v30 = vunpack.i.l.bf16 %v4047_v25  ;;  %v4116_v25 = vld [vmem:[%s4410_s21 + $0x70] sm:$0xff]  }
 0xd48   : > { %v2662_v33 = vsel %vm2660_vm5, %v2659_v32, %v4049_v29  ;;  %v2661_v34 = vsel %vm2660_vm5, %v2658_v31, %v4048_v30  ;;  %v4119_v29 = vld [vmem:[%s4410_s21 + $0x28] sm:$0xff]   ;;  %v4120_v30 = vld [vmem:[%s4410_s21 + $0x60] sm:$0xff]   ;;  %v4122_v32 = vld [vmem:[%s4410_s21 + $0x58] sm:$0xff]  }
 0xd49   : > { %v2663_v36 = vpack.c.bf16 %v2662_v33, %v2661_v34  ;;  %v4121_v31 = vld [vmem:[%s4410_s21 + $0x20] sm:$0xff]   ;;  %v4123_v33 = vld [vmem:[%s4410_s21 + $0x18] sm:$0xff]   ;;  %v4124_v34 = vld [vmem:[%s4410_s21 + $0x50] sm:$0xff]  }
 0xd4b   : > { %3947 = vmatmul.mubr.bf16.vlgmr.msra.gmra.mxu0 %v2663_v36  ;;  %v4125_v36 = vld [vmem:[%s4410_s21 + $0x10] sm:$0xff]  }
 0xd4c   : > { %3793 = vmatpush3.bf16.msra.mxu0 %v4115_v5 }
 0xd4d   : > { %3794 = vmatprep.subr.bf16.mxu0 %v4116_v25 }
 0xd50   : > { %3795 = vmatpush3.bf16.msra.mxu0 %v4117_v26 }
 0xd51   : > { %3796 = vmatprep.subr.bf16.mxu0 %v4118_v27 }
 0xd54   : > { %3797 = vmatpush3.bf16.msra.mxu0 %v4119_v29 }
 0xd55   : > { %3798 = vmatprep.subr.bf16.mxu0 %v4120_v30 }
 0xd58   : > { %3799 = vmatpush3.bf16.msra.mxu0 %v4121_v31 }
 0xd59   : > { %3800 = vmatprep.subr.bf16.mxu0 %v4122_v32 }
 0xd5c   : > { %3801 = vmatpush3.bf16.msra.mxu0 %v4123_v33 }
 0xd5d   : > { %3802 = vmatprep.subr.bf16.mxu0 %v4124_v34  ;;  %v3673_v34 = vld [vmem:[%s5045_s11] ss:$0 sm:$0xff] }
 0xd60   : > { %3803 = vmatpush3.bf16.msra.mxu0 %v4125_v36 }
 0xe0b   : > { %v2762_v38 = vpop.f32.mrf.mxu0 }
 0xe0c   : > { %v2769_v40 = vadd.f32 %v4178_v55, %v2762_v38  ;;  %v4126_v38 = vld [vmem:[%s4410_s21 + $0x48] sm:$0xff]   ;;  %v4128_v55 = vld [vmem:[%s4410_s21 + $0x40] sm:$0xff]  }
 0xe0d   : > { %v3948_v41 = vpop.f32.mrf.mxu0  ;;  %3804 = vmatprep.subr.bf16.mxu0 %v4126_v38 }
 0xe0e   : > { %v4838_v50 = vadd.f32 %v3638_v39, %v2769_v40  ;;  %v4129_v40 = vld [vmem:[%s4410_s21] sm:$0xff]   ;;  %v2839_v41 = vlaneseq }
 0xe0f   : > { %v2765_v43 = vpop.f32.mrf.mxu0 }
 0xe10   : > { %v2770_v46 = vadd.f32 %v4179_v45, %v2765_v43  ;;  %2782 = vadd.xlane.f32.xlu1 %v4838_v50  ;;  %v4888_v43 = vshrl.u32 %v2839_v41, 7 }
 0xe11   : > { %v3949_v47 = vpop.f32.mrf.mxu0 }
 0xe12   : > { %v4841_v48 = vadd.f32 %v3638_v39, %v2770_v46  ;;  %v4127_v39 = vld [vmem:[%s4410_s21 + $0x8] sm:$0xff]   ;;  %v2841_v45 = vsub.s32 0, %v4888_v43  ;;  %v2837_v46 = vld [vmem:[%s4405_s24] sm:$0x3]  ;;  %v2845_v47 = vsub.s32 1, %v4888_v43 }
 0xe13   : > { %3805 = vmatpush3.bf16.msra.mxu0 %v4127_v39 }
 0xe14   : > { %2784 = vadd.xlane.f32.xlu0 %v4841_v48  ;;  %3806 = vmatprep.subr.bf16.mxu0 %v4128_v55  ;;  %v2842_v49 = vrot.slane %v2837_v46, %v2841_v45  ;;  %v2846_v51 = vrot.slane %v2837_v46, %v2845_v47 }
 0xe17   : > { %3807 = vmatpush3.bf16.msra.mxu0 %v4129_v40 }
 0xe99   : > { %v2783_v52 = vpop.xlane.xlu1 %2782 }
 0xe9a   : > { %v2786_v53 = vmul.f32 0.0078125, %v2783_v52 }
 0xe9c   : > { %v2788_v54 = vsub.f32 %v4838_v50, %v2786_v53 }
 0xe9d   : > { %v2785_v56 = vpop.xlane.xlu0 %2784 }
 0xe9e   : > { %v2787_v37 = vmul.f32 0.0078125, %v2785_v56  ;;  %v2790_v57 = vmul.f32 %v2788_v54, %v2788_v54 }
 0xea0   : > { %v2789_v35 = vsub.f32 %v4841_v48, %v2787_v37  ;;  %2792 = vadd.xlane.f32.xlu0 %v2790_v57 }
 0xea2   : > { %v2791_v42 = vmul.f32 %v2789_v35, %v2789_v35 }
 0xea4   : > { %2794 = vadd.xlane.f32.xlu0 %v2791_v42 }
 0xf29   : > { %v2793_v9 = vpop.xlane.xlu0 %2792 }
 0xf2a   : > { %v2796_v28 = vmul.f32 0.0078125, %v2793_v9 }
 0xf2c   : > { %v2798_v10 = vadd.f32 1e-05, %v2796_v28 }
 0xf2d   : > { %v2795_v11 = vpop.xlane.xlu0 %2794 }
 0xf2e   : > { %4166 = vrsqrt.f32 %v2798_v10  ;;  %v2797_v12 = vmul.f32 0.0078125, %v2795_v11 }
 0xf30   : > { %v2799_v13 = vadd.f32 1e-05, %v2797_v12 }
 0xf32   : > { %4168 = vrsqrt.f32 %v2799_v13 }
 0xf3b   : > { %v4167_v14 = vpop.eup %4166 }
 0xf3c   : > { %v2802_v15 = vmul.f32 %v4167_v14, %v2788_v54 }
 0xf3e   : > { %v2810_v18 = vmul.f32 %v3639_v16, %v2802_v15 }
 0xf3f   : > { %v4169_v2 = vpop.eup %4168 }
 0xf40   : > { %v2803_v17 = vmul.f32 %v4169_v2, %v2789_v35  ;;  %v2818_v21 = vadd.f32 %v3640_v19, %v2810_v18 }
 0xf42   : > { %v2811_v20 = vmul.f32 %v3639_v16, %v2803_v17 }
 0xf44   : > { %v2819_v22 = vadd.f32 %v3640_v19, %v2811_v20 }
 0xf46   : > { %v2820_v23 = vpack.c.bf16 %v2819_v22, %v2818_v21 }
 0xf48   : > { %2962 = vmatmul.mubr.bf16.vlgmr.msra.gmra.mxu1 %v2820_v23 }
0x1008   : > { %v2963_v52 = vpop.f32.mrf.mxu1 }
0x1009   : > { %v2964_v53 = vadd.f32 %v2963_v52, %v2842_v49 }
0x100a   : > { %v2965_v54 = vpop.f32.mrf.mxu1 }
0x100b   : > { %v2976_v56 = vmul.f32 0.044715, %v2964_v53  ;;  %v2966_v37 = vadd.f32 %v2965_v54, %v2846_v51  ;;  %v2972_v24 = vmul.f32 0.5, %v2964_v53 }
0x100c   : > { %v2967_v57 = vpop.f32.mrf.mxu1 }
0x100d   : > { %v2980_v35 = vmul.f32 %v2976_v56, %v2964_v53  ;;  %v2977_v42 = vmul.f32 0.044715, %v2966_v37  ;;  %v2968_v44 = vadd.f32 %v2967_v57, %v2842_v49  ;;  %v2973_v21 = vmul.f32 0.5, %v2966_v37 }
0x100e   : > { %v2969_v59 = vpop.f32.mrf.mxu1 }
0x100f   : > { %v2984_v60 = vmul.f32 %v2980_v35, %v2964_v53  ;;  %v2981_v61 = vmul.f32 %v2977_v42, %v2966_v37  ;;  %v2978_v62 = vmul.f32 0.044715, %v2968_v44  ;;  %v2970_v63 = vadd.f32 %v2969_v59, %v2846_v51 }
0x1010   : > { %v2974_v19 = vmul.f32 0.5, %v2968_v44 }
0x1011   : > { %v2988_v0 = vadd.f32 %v2984_v60, %v2964_v53  ;;  %v2985_v6 = vmul.f32 %v2981_v61, %v2966_v37  ;;  %v2982_v3 = vmul.f32 %v2978_v62, %v2968_v44  ;;  %v2979_v58 = vmul.f32 0.044715, %v2970_v63 }
0x1012   : > { %v2975_v22 = vmul.f32 0.5, %v2970_v63 }
0x1013   : > { %v2986_v1 = vmul.f32 %v2982_v3, %v2968_v44  ;;  %v2983_v4 = vmul.f32 %v2979_v58, %v2970_v63  ;;  %v2989_v7 = vadd.f32 %v2985_v6, %v2966_v37  ;;  %v2992_v8 = vmul.f32 0.7978846, %v2988_v0 }
0x1015   : > { %v2990_v9 = vadd.f32 %v2986_v1, %v2968_v44  ;;  %v2987_v28 = vmul.f32 %v2983_v4, %v2970_v63  ;;  %v2993_v10 = vmul.f32 0.7978846, %v2989_v7 }
0x1017   : > { %v2994_v11 = vmul.f32 0.7978846, %v2990_v9  ;;  %v2991_v12 = vadd.f32 %v2987_v28, %v2970_v63  ;;  %4170 = vtanh.f32 %v2993_v10 }
0x1018   : > { %4172 = vtanh.f32 %v2992_v8 }
0x1019   : > { %4174 = vtanh.f32 %v2994_v11  ;;  %v2995_v13 = vmul.f32 0.7978846, %v2991_v12 }
0x101b   : > { %4176 = vtanh.f32 %v2995_v13 }
0x1024   : > { %v4171_v14 = vpop.eup %4170 }
0x1025   : > { %v4173_v15 = vpop.eup %4172  ;;  %v3001_v2 = vadd.f32 1.0, %v4171_v14 }
0x1026   : > { %v4175_v16 = vpop.eup %4174  ;;  %v3000_v20 = vadd.f32 1.0, %v4173_v15 }
0x1027   : > { %v3002_v17 = vadd.f32 1.0, %v4175_v16  ;;  %v3005_v25 = vmul.f32 %v3001_v2, %v2973_v21 }
0x1028   : > { %v4177_v18 = vpop.eup %4176  ;;  %v3004_v27 = vmul.f32 %v3000_v20, %v2972_v24 }
0x1029   : > { %v3003_v23 = vadd.f32 1.0, %v4177_v18  ;;  %v3006_v5 = vmul.f32 %v3002_v17, %v2974_v19 }
0x102b   : > { %v3007_v26 = vmul.f32 %v3003_v23, %v2975_v22  ;;  %v3008_v30 = vpack.c.bf16 %v3006_v5, %v3004_v27 }
0x102d   : > { %v3009_v29 = vpack.c.bf16 %v3007_v26, %v3005_v25 }
0x102f   : > { %3170 = vmatprep.mubr.bf16.mxu0 %v3009_v29 }
0x1030   : > { %3171 = vmatmul.mubr.bf16.vlgmr.msra.gmra.mxu0 %v3008_v30 }
0x10f0   : > { %v3808_v31 = vpop.f32.mrf.mxu0 }
0x10f2   : > { %v3809_v32 = vpop.f32.mrf.mxu0 }
0x10f3   : > { %v3810_v33 = vadd.f32 %v3809_v32, %v3808_v31 }
0x10f4   : > { %v3811_v36 = vpop.f32.mrf.mxu0 }
0x10f5   : > { %v3179_v38 = vadd.f32 %v3810_v33, %v4838_v50 }
0x10f6   : > { %v3812_v39 = vpop.f32.mrf.mxu0 }
0x10f7   : > { %v3188_v55 = vadd.f32 %v3673_v34, %v3179_v38  ;;  %v3813_v40 = vadd.f32 %v3812_v39, %v3811_v36 }
0x10f9   : > { %3190 = vst [vmem:[#allocation2] sm:$0xff] %v3188_v55  ;;  %v3180_v41 = vadd.f32 %v3813_v40, %v4841_v48  ;;  %3195 = sbr.rel (%p3674_p5) target bundleno = 4864 (0x1300), region = 124 }
0x10fb   : > { %v3189_v46 = vadd.f32 %v3673_v34, %v3180_v41 }
0x10fd   : > { %3191 = vst [vmem:[#allocation2 + $0x8] sm:$0xff] %v3189_v46 }
0x10fe   : > { %3198 = vadd.xlane.f32.xlu0 %v3188_v55  ;;  %v4180_v49 = vld [vmem:[%s5003_s22 + $0x74] ss:$8 sps:$4 sm:$0xff]   ;;  %v4182_v57 = vld [vmem:[%s5003_s22 + $0x70] ss:$8 sps:$4 sm:$0xff]   ;;  %v4183_v35 = vld [vmem:[%s5003_s22 + $0x64] ss:$8 sps:$4 sm:$0xff]  }
0x10ff   : > { %3345 = vmatprep.subr.bf16.mxu0 %v4180_v49  ;;  %v4185_v42 = vld [vmem:[%s5003_s22 + $0x60] ss:$8 sps:$4 sm:$0xff]   ;;  %v4186_v44 = vld [vmem:[%s5003_s22 + $0x54] ss:$8 sps:$4 sm:$0xff]   ;;  %v4188_v59 = vld [vmem:[%s5003_s22 + $0x50] ss:$8 sps:$4 sm:$0xff]  }
0x1100   : > { %3346 = vmatpush1.bf16.msra.mxu0 %v4182_v57  ;;  %v4189_v60 = vld [vmem:[%s5003_s22 + $0x44] ss:$8 sps:$4 sm:$0xff]   ;;  %v4191_v61 = vld [vmem:[%s5003_s22 + $0x40] ss:$8 sps:$4 sm:$0xff]   ;;  %v4192_v62 = vld [vmem:[%s5003_s22 + $0x34] ss:$8 sps:$4 sm:$0xff]  }
0x1101   : > { %3347 = vmatprep.subr.bf16.mxu0 %v4183_v35  ;;  %v4194_v63 = vld [vmem:[%s5003_s22 + $0x30] ss:$8 sps:$4 sm:$0xff]   ;;  %v4195_v0 = vld [vmem:[%s5003_s22 + $0x24] ss:$8 sps:$4 sm:$0xff]   ;;  %v4223_v6 = vmov 0  }
0x1102   : > { %3200 = vadd.xlane.f32.xlu0 %v3189_v46  ;;  %3377 = vmatprep.mubr.bf16.mxu0 %v4223_v6  ;;  %v4197_v3 = vld [vmem:[%s5003_s22 + $0x20] ss:$8 sps:$4 sm:$0xff]   ;;  %v4198_v58 = vld [vmem:[%s5003_s22 + $0x14] ss:$8 sps:$4 sm:$0xff]   ;;  %v4200_v1 = vld [vmem:[%s5003_s22 + $0x10] ss:$8 sps:$4 sm:$0xff]  }
0x1103   : > { %v4201_v4 = vld [vmem:[%s5003_s22 + $0x4] ss:$8 sps:$4 sm:$0xff]   ;;  %v4203_v7 = vld [vmem:[%s5003_s22] ss:$8 sps:$4 sm:$0xff]  }
0x1104   : > { %3348 = vmatpush1.bf16.msra.mxu0 %v4185_v42  ;;  %v3675_v15 = vld [vmem:[%s5046_s27] ss:$0 sm:$0xff] }
0x1105   : > { %3349 = vmatprep.subr.bf16.mxu0 %v4186_v44  ;;  %v3676_v18 = vld [vmem:[%s5047_s6] ss:$0 sm:$0xff] }
0x1106   : > { %v3253_v23 = vld [vmem:[%s5048_s1] sm:$0x3] }
0x1107   : > { %v3258_v24 = vrot.slane %v3253_v23, %v2841_v45  ;;  %v3262_v5 = vrot.slane %v3253_v23, %v2845_v47 }
0x1108   : > { %3350 = vmatpush1.bf16.msra.mxu0 %v4188_v59 }
0x1109   : > { %3351 = vmatprep.subr.bf16.mxu0 %v4189_v60 }
0x110c   : > { %3352 = vmatpush1.bf16.msra.mxu0 %v4191_v61 }
0x110d   : > { %3353 = vmatprep.subr.bf16.mxu0 %v4192_v62 }
0x1110   : > { %3354 = vmatpush1.bf16.msra.mxu0 %v4194_v63 }
0x1111   : > { %3355 = vmatprep.subr.bf16.mxu0 %v4195_v0 }
0x1114   : > { %3356 = vmatpush1.bf16.msra.mxu0 %v4197_v3 }
0x1115   : > { %3357 = vmatprep.subr.bf16.mxu0 %v4198_v58 }
0x1118   : > { %3358 = vmatpush1.bf16.msra.mxu0 %v4200_v1 }
0x1119   : > { %3359 = vmatprep.subr.bf16.mxu0 %v4201_v4 }
0x111c   : > { %3360 = vmatpush1.bf16.msra.mxu0 %v4203_v7 }
0x1187   : > { %v3199_v51 = vpop.xlane.xlu0 %3198 }
0x1188   : > { %v3202_v50 = vmul.f32 0.0078125, %v3199_v51 }
0x118a   : > { %v3204_v52 = vsub.f32 %v3188_v55, %v3202_v50 }
0x118b   : > { %v3201_v53 = vpop.xlane.xlu0 %3200 }
0x118c   : > { %v3203_v54 = vmul.f32 0.0078125, %v3201_v53  ;;  %v3206_v56 = vmul.f32 %v3204_v52, %v3204_v52 }
0x118e   : > { %v3205_v37 = vsub.f32 %v3189_v46, %v3203_v54  ;;  %3208 = vadd.xlane.f32.xlu1 %v3206_v56 }
0x1190   : > { %v3207_v48 = vmul.f32 %v3205_v37, %v3205_v37 }
0x1192   : > { %3210 = vadd.xlane.f32.xlu1 %v3207_v48 }
0x1217   : > { %v3209_v8 = vpop.xlane.xlu1 %3208 }
0x1218   : > { %v3212_v9 = vmul.f32 0.0078125, %v3209_v8 }
0x121a   : > { %v3214_v28 = vadd.f32 1e-05, %v3212_v9 }
0x121b   : > { %v3211_v10 = vpop.xlane.xlu1 %3210 }
0x121c   : > { %4204 = vrsqrt.f32 %v3214_v28  ;;  %v3213_v11 = vmul.f32 0.0078125, %v3211_v10 }
0x121e   : > { %v3215_v12 = vadd.f32 1e-05, %v3213_v11 }
0x1220   : > { %4206 = vrsqrt.f32 %v3215_v12 }
0x1229   : > { %v4205_v13 = vpop.eup %4204 }
0x122a   : > { %v3218_v14 = vmul.f32 %v4205_v13, %v3204_v52 }
0x122c   : > { %v3226_v17 = vmul.f32 %v3675_v15, %v3218_v14 }
0x122d   : > { %v4207_v16 = vpop.eup %4206 }
0x122e   : > { %v3219_v2 = vmul.f32 %v4207_v16, %v3205_v37  ;;  %v3234_v20 = vadd.f32 %v3676_v18, %v3226_v17 }
0x1230   : > { %v3227_v19 = vmul.f32 %v3675_v15, %v3219_v2 }
0x1232   : > { %v3235_v21 = vadd.f32 %v3676_v18, %v3227_v19 }
0x1234   : > { %v3236_v22 = vpack.c.bf16 %v3235_v21, %v3234_v20 }
0x1236   : > { %3378 = vmatmul.mubr.bf16.vlgmr.msra.gmra.mxu0 %v3236_v22 }
0x12f6   : > { %v3379_v25 = vpop.f32.mrf.mxu0 }
0x12f7   : > { %v3380_v26 = vadd.f32 %v3379_v25, %v3258_v24 }
0x12f8   : > { %v3381_v27 = vpop.f32.mrf.mxu0 }
0x12f9   : > { %3388 = vst [vmem:[%s5049_s30] sm:$0xff] %v3380_v26  ;;  %v3382_v29 = vadd.f32 %v3381_v27, %v3262_v5 }
0x12fa   : > { %v3383_v30 = vpop.f32.mrf.mxu0 }
0x12fb   : > { %3389 = vst [vmem:[%s5049_s30 + $0x8] sm:$0xff] %v3382_v29  ;;  %v3384_v31 = vadd.f32 %v3383_v30, %v3258_v24 }
0x12fc   : > { %v3385_v32 = vpop.f32.mrf.mxu0 }
0x12fd   : > { %3390 = vst [vmem:[%s5049_s30 + $0x10] sm:$0xff] %v3384_v31  ;;  %v3386_v43 = vadd.f32 %v3385_v32, %v3262_v5 }
0x12ff   : > { %3391 = vst [vmem:[%s5049_s30 + $0x18] sm:$0xff] %v3386_v43 }
0x1300 PF: > { %s5050_s27 = sld [smem:[#allocation3_spill]] }
0x1306   : > { %s34_s5 = sadd.s32 1, %s5050_s27  }
0x1307   : > { %p31_p6 = scmp.ge.s32.totalorder %s34_s5, 4  }
0x1309   :  { %33 = sbr.rel (!%p31_p6) target bundleno = 16 (0x10), region = 180 }

</bundles_post_ra>
